<compile_context>
chip_gen: v6e
topology: v6e:2x2x1
jax: 0.10.0
libtpu: 0.0.40
codegen_flags: <defaults>
</compile_context>

<pallas_src>
import functools

import jax
import jax.numpy as jnp
from jax import lax
from jax.experimental import pallas as pl
from jax.experimental.pallas import tpu as pltpu


def _mha_kernel(x_ref, w_ref, b_ref, gamma_ref, o_ref, *, num_heads, d, pq, pk, pvr):
    # x_ref:     (1, C, N)  channel-major x (free NCHW reshape), lane-dense
    # w_ref:     (R, C)     fused per-head [Q | K | V+ones] weight blocks, tile-padded
    # b_ref:     (R, 1)     matching bias column (ones-row bias = 1, pad rows = 0)
    # gamma_ref: (1,)       scalar in SMEM
    # o_ref:     (1, C, N)  lane-dense channel-major output
    gamma = gamma_ref[0]
    x_cn = x_ref[0]                                              # (C, N) f32

    # Fused Q/K/V/ones projection for all heads, channel-major (R, N); biases folded
    # in via one broadcast add.  Tiny contraction dim -> keep f32.
    proj = jnp.dot(w_ref[...], x_cn,
                   preferred_element_type=jnp.float32) + b_ref[...]

    hb = pq + pk + pvr
    head_outs = []
    for h in range(num_heads):                                   # trace-time unrolled
        base = h * hb
        q = proj[base:base + pq, :]                              # (pq, N), rows d.. = 0
        k = proj[base + pq:base + pq + pk, :]                    # (pk, N), rows d.. = 0
        v_aug = proj[base + pq + pk:base + hb, :]                # (pvr, N): V, ones, 0s

        # scores: contract the channel (sublane) axis of two lane-dense operands.
        # bf16 MXU feeds, f32 accumulation.
        s = lax.dot_general(q.astype(jnp.bfloat16), k.astype(jnp.bfloat16),
                            dimension_numbers=(((0,), (0,)), ((), ())),
                            preferred_element_type=jnp.float32)  # (N, N)
        s = s - jnp.max(s, axis=-1, keepdims=True)
        p = jnp.exp(s)                                           # unnormalized probs, f32

        # (pvr, N): rows 0..d-1 = (attn @ V)^T unnormalized, row d = softmax denom.
        pv = lax.dot_general(v_aug.astype(jnp.bfloat16), p.astype(jnp.bfloat16),
                             dimension_numbers=(((1,), (1,)), ((), ())),
                             preferred_element_type=jnp.float32)
        inv_l = pl.reciprocal(pv[d:d + 1, :], approx=True)       # (1, N) on the EUP
        head_outs.append(pv[:d, :] * inv_l)                      # (d, N) normalized

    attn = jnp.concatenate(head_outs, axis=0)                    # (C, N)
    # Single unmasked full-block store: gamma * attention + residual, channel-major.
    o_ref[0] = gamma * attn + x_cn


def _ceil8(n):
    return ((n + 7) // 8) * 8


def multi_head_attention(x, wq, bq, wk, bk, wv, bv, gamma, num_heads=2):
    """x: (B, C, W, H) NCHW float32.  w*: (C, C) 1x1-conv weights, b*: (C,)."""
    B, C, W, H = x.shape
    d = C // num_heads
    N = W * H
    pq = _ceil8(d)            # Q rows per head, padded to a sublane tile
    pk = _ceil8(d)            # K rows per head, padded
    pvr = _ceil8(d + 1)       # V rows + ones row per head, padded
    hb = pq + pk + pvr
    R = num_heads * hb

    f32 = jnp.float32
    x = x.astype(f32)
    wq, wk, wv = wq.astype(f32), wk.astype(f32), wv.astype(f32)
    bq, bk, bv = bq.astype(f32), bk.astype(f32), bv.astype(f32)

    x_cn = x.reshape(B, C, N)        # free reshape of NCHW; lane-dense N, no HBM copy

    # Fused per-head weight blocks, each padded to 8-row (sublane tile) boundaries:
    #   [ Wq_h ; 0 ]                  (pq rows)  -> q, channel-major
    #   [ Wk_h ; 0 ]                  (pk rows)  -> k, channel-major
    #   [ Wv_h ; 0-row ; 0 ]          (pvr rows) with bias [bv_h ; 1 ; 0]
    #                                 -> V rows + all-ones row (softmax denominator)
    zc = lambda n: jnp.zeros((n, C), f32)
    zb = lambda n: jnp.zeros((n,), f32)
    w_blocks, b_blocks = [], []
    for h in range(num_heads):
        sl = slice(h * d, (h + 1) * d)
        w_blocks += [wq[sl], zc(pq - d)]
        b_blocks += [bq[sl], zb(pq - d)]
        w_blocks += [wk[sl], zc(pk - d)]
        b_blocks += [bk[sl], zb(pk - d)]
        w_blocks += [wv[sl], zc(pvr - d)]
        b_blocks += [bv[sl], jnp.ones((1,), f32), zb(pvr - d - 1)]
    w_fused = jnp.concatenate(w_blocks, axis=0)                  # (R, C)
    b_fused = jnp.concatenate(b_blocks, axis=0)[:, None]         # (R, 1)

    gamma_arr = jnp.asarray(gamma, f32).reshape(1)

    out = pl.pallas_call(
        functools.partial(_mha_kernel, num_heads=num_heads, d=d,
                          pq=pq, pk=pk, pvr=pvr),
        out_shape=jax.ShapeDtypeStruct((B, C, N), f32),
        grid=(B,),
        in_specs=[
            pl.BlockSpec((1, C, N), lambda b: (b, 0, 0)),        # x channel-major
            pl.BlockSpec((R, C), lambda b: (0, 0)),              # fused Q/K/V/ones weight
            pl.BlockSpec((R, 1), lambda b: (0, 0)),              # fused bias column
            pl.BlockSpec(memory_space=pltpu.MemorySpace.SMEM),   # gamma scalar
        ],
        out_specs=pl.BlockSpec((1, C, N), lambda b: (b, 0, 0)),  # lane-dense output
        compiler_params=pltpu.CompilerParams(
            dimension_semantics=("parallel",)),                  # v7x: 2 TCs, B even
    )(x_cn, w_fused, b_fused, gamma_arr)

    # (B, C, N) -> (B, C, W, H): pure reshape, no transpose needed.
    return out.reshape(B, C, W, H)


def _reference(x, wq, bq, wk, bk, wv, bv, gamma, num_heads=2):
    """Pure-JAX transcription of the PyTorch forward for verification."""
    B, C, W, H = x.shape
    d = C // num_heads
    N = W * H

    def conv1x1(x, w, b):
        return jnp.einsum('bchw,oc->bohw', x, w) + b[None, :, None, None]

    q = conv1x1(x, wq, bq).reshape(B, num_heads, d, N)
    k = conv1x1(x, wk, bk).reshape(B, num_heads, d, N)
    v = conv1x1(x, wv, bv).reshape(B, num_heads, d, N)
    q = jnp.transpose(q, (0, 1, 3, 2)).reshape(B * num_heads, N, d)
    k = k.reshape(B * num_heads, d, N)
    att = jax.nn.softmax(jnp.matmul(q, k), axis=-1)
    v = jnp.transpose(v, (0, 1, 3, 2)).reshape(B * num_heads, N, d)
    out = jnp.matmul(att, v)
    out = jnp.transpose(out.reshape(B, num_heads, N, d), (0, 1, 3, 2)).reshape(B, C, W, H)
    return gamma * out + x


if __name__ == "__main__":
    B, C, W, H = 2, 4, 16, 16
    num_heads = 2

    key = jax.random.PRNGKey(0)
    kx, kq, kk, kv, kbq, kbk, kbv = jax.random.split(key, 7)

    x = jax.random.normal(kx, (B, C, W, H), dtype=jnp.float32)
    # nn.Conv2d(in_dim, in_dim, kernel_size=1) parameters (weights as (C_out, C_in))
    wq = jax.random.normal(kq, (C, C), dtype=jnp.float32) * 0.1
    wk = jax.random.normal(kk, (C, C), dtype=jnp.float32) * 0.1
    wv = jax.random.normal(kv, (C, C), dtype=jnp.float32) * 0.1
    bq = jax.random.normal(kbq, (C,), dtype=jnp.float32) * 0.1
    bk = jax.random.normal(kbk, (C,), dtype=jnp.float32) * 0.1
    bv = jax.random.normal(kbv, (C,), dtype=jnp.float32) * 0.1
    gamma = jnp.float32(0.0)  # nn.Parameter(torch.zeros(1)) in __init__

    # With the module's initial gamma (=0) the output must equal x exactly.
    out0 = jax.block_until_ready(
        multi_head_attention(x, wq, bq, wk, bk, wv, bv, gamma, num_heads))
    ref0 = _reference(x, wq, bq, wk, bk, wv, bv, gamma, num_heads)
    assert jnp.allclose(out0, ref0, atol=1e-5, rtol=1e-5)

    # Nonzero gamma exercises the attention path (tolerance covers the bf16 MXU feeds
    # and the approx EUP reciprocal used for the softmax normalization).
    out1 = jax.block_until_ready(
        multi_head_attention(x, wq, bq, wk, bk, wv, bv, jnp.float32(0.5), num_heads))
    ref1 = _reference(x, wq, bq, wk, bk, wv, bv, jnp.float32(0.5), num_heads)
    assert jnp.allclose(out1, ref1, atol=5e-3, rtol=5e-3)

    print("KERNEL_OK")
</pallas_src>

<mosaic_0001>
module attributes {stable_mosaic.version = 11 : i64} {
  func.func @_mha_kernel(%arg0: i32, %arg1: memref<1x4x256xf32, #tpu.memory_space<vmem>>, %arg2: memref<48x4xf32, #tpu.memory_space<vmem>>, %arg3: memref<48x1xf32, #tpu.memory_space<vmem>>, %arg4: memref<1xf32, #tpu.memory_space<smem>>, %arg5: memref<1x4x256xf32, #tpu.memory_space<vmem>>) attributes {dimension_semantics = [#tpu.dimension_semantics<parallel>], iteration_bounds = array<i64: 2>, scalar_prefetch = 0 : i64, scratch_operands = 0 : i64, tpu.core_type = #tpu.core_type<tc>, window_params = [{transform_indices = @transform_0, window_bounds = array<i64: 1, 4, 256>}, {pipeline_mode = #tpu.pipeline_mode<synchronous>, transform_indices = @transform_1, window_bounds = array<i64: 48, 4>}, {pipeline_mode = #tpu.pipeline_mode<synchronous>, transform_indices = @transform_2, window_bounds = array<i64: 48, 1>}, {transform_indices = @transform_3, window_bounds = array<i64: 1>}, {transform_indices = @transform_4, window_bounds = array<i64: 1, 4, 256>}]} {
    %c0 = arith.constant 0 : index
    %0 = memref.load %arg4[%c0] : memref<1xf32, #tpu.memory_space<smem>>
    %c0_0 = arith.constant 0 : index
    %c0_1 = arith.constant 0 : index
    %c0_2 = arith.constant 0 : index
    %1 = vector.load %arg1[%c0_0, %c0_1, %c0_2] : memref<1x4x256xf32, #tpu.memory_space<vmem>>, vector<1x4x256xf32>
    %2 = vector.shape_cast %1 : vector<1x4x256xf32> to vector<4x256xf32>
    %c0_3 = arith.constant 0 : index
    %c0_4 = arith.constant 0 : index
    %3 = vector.load %arg2[%c0_3, %c0_4] : memref<48x4xf32, #tpu.memory_space<vmem>>, vector<48x4xf32>
    %cst = arith.constant dense<0.000000e+00> : vector<48x256xf32>
    %4 = tpu.matmul %3, %2, %cst {dimension_numbers = #tpu.dot_dimension_numbers<[1], [0], [0], [1], [0, 0, 1, 1], [], []>} : vector<48x4xf32>, vector<4x256xf32>, vector<48x256xf32> -> vector<48x256xf32>
    %c0_5 = arith.constant 0 : index
    %c0_6 = arith.constant 0 : index
    %5 = vector.load %arg3[%c0_5, %c0_6] : memref<48x1xf32, #tpu.memory_space<vmem>>, vector<48x1xf32>
    %6 = vector.broadcast %5 : vector<48x1xf32> to vector<48x256xf32>
    %7 = arith.addf %4, %6 : vector<48x256xf32>
    %8 = vector.extract_strided_slice %7 {offsets = [0, 0], sizes = [8, 256], strides = [1, 1]} : vector<48x256xf32> to vector<8x256xf32>
    %9 = vector.extract_strided_slice %7 {offsets = [8, 0], sizes = [8, 256], strides = [1, 1]} : vector<48x256xf32> to vector<8x256xf32>
    %10 = vector.extract_strided_slice %7 {offsets = [16, 0], sizes = [8, 256], strides = [1, 1]} : vector<48x256xf32> to vector<8x256xf32>
    %11 = arith.truncf %8 : vector<8x256xf32> to vector<8x256xbf16>
    %12 = arith.truncf %9 : vector<8x256xf32> to vector<8x256xbf16>
    %cst_7 = arith.constant dense<0.000000e+00> : vector<256x256xf32>
    %13 = tpu.matmul %11, %12, %cst_7 {dimension_numbers = #tpu.dot_dimension_numbers<[0], [0], [1], [1], [0, 1, 1, 1], [], []>} : vector<8x256xbf16>, vector<8x256xbf16>, vector<256x256xf32> -> vector<256x256xf32>
    %cst_8 = arith.constant dense<0xFF800000> : vector<256xf32>
    %14 = vector.multi_reduction <maximumf>, %13, %cst_8 [1] : vector<256x256xf32> to vector<256xf32>
    %15 = vector.shape_cast %14 : vector<256xf32> to vector<256x1xf32>
    %16 = vector.broadcast %15 : vector<256x1xf32> to vector<256x256xf32>
    %17 = arith.subf %13, %16 : vector<256x256xf32>
    %18 = math.exp %17 : vector<256x256xf32>
    %19 = arith.truncf %10 : vector<8x256xf32> to vector<8x256xbf16>
    %20 = arith.truncf %18 : vector<256x256xf32> to vector<256x256xbf16>
    %cst_9 = arith.constant dense<0.000000e+00> : vector<8x256xf32>
    %21 = tpu.matmul %19, %20, %cst_9 {dimension_numbers = #tpu.dot_dimension_numbers<[1], [1], [0], [0], [0, 0, 1, 0], [], []>} : vector<8x256xbf16>, vector<256x256xbf16>, vector<8x256xf32> -> vector<8x256xf32>
    %22 = vector.extract_strided_slice %21 {offsets = [2, 0], sizes = [1, 256], strides = [1, 1]} : vector<8x256xf32> to vector<1x256xf32>
    %23 = tpu.reciprocal %22 {approx = true} : vector<1x256xf32> -> vector<1x256xf32>
    %24 = vector.extract_strided_slice %21 {offsets = [0, 0], sizes = [2, 256], strides = [1, 1]} : vector<8x256xf32> to vector<2x256xf32>
    %25 = vector.broadcast %23 : vector<1x256xf32> to vector<2x256xf32>
    %26 = arith.mulf %24, %25 : vector<2x256xf32>
    %27 = vector.extract_strided_slice %7 {offsets = [24, 0], sizes = [8, 256], strides = [1, 1]} : vector<48x256xf32> to vector<8x256xf32>
    %28 = vector.extract_strided_slice %7 {offsets = [32, 0], sizes = [8, 256], strides = [1, 1]} : vector<48x256xf32> to vector<8x256xf32>
    %29 = vector.extract_strided_slice %7 {offsets = [40, 0], sizes = [8, 256], strides = [1, 1]} : vector<48x256xf32> to vector<8x256xf32>
    %30 = arith.truncf %27 : vector<8x256xf32> to vector<8x256xbf16>
    %31 = arith.truncf %28 : vector<8x256xf32> to vector<8x256xbf16>
    %cst_10 = arith.constant dense<0.000000e+00> : vector<256x256xf32>
    %32 = tpu.matmul %30, %31, %cst_10 {dimension_numbers = #tpu.dot_dimension_numbers<[0], [0], [1], [1], [0, 1, 1, 1], [], []>} : vector<8x256xbf16>, vector<8x256xbf16>, vector<256x256xf32> -> vector<256x256xf32>
    %cst_11 = arith.constant dense<0xFF800000> : vector<256xf32>
    %33 = vector.multi_reduction <maximumf>, %32, %cst_11 [1] : vector<256x256xf32> to vector<256xf32>
    %34 = vector.shape_cast %33 : vector<256xf32> to vector<256x1xf32>
    %35 = vector.broadcast %34 : vector<256x1xf32> to vector<256x256xf32>
    %36 = arith.subf %32, %35 : vector<256x256xf32>
    %37 = math.exp %36 : vector<256x256xf32>
    %38 = arith.truncf %29 : vector<8x256xf32> to vector<8x256xbf16>
    %39 = arith.truncf %37 : vector<256x256xf32> to vector<256x256xbf16>
    %cst_12 = arith.constant dense<0.000000e+00> : vector<8x256xf32>
    %40 = tpu.matmul %38, %39, %cst_12 {dimension_numbers = #tpu.dot_dimension_numbers<[1], [1], [0], [0], [0, 0, 1, 0], [], []>} : vector<8x256xbf16>, vector<256x256xbf16>, vector<8x256xf32> -> vector<8x256xf32>
    %41 = vector.extract_strided_slice %40 {offsets = [2, 0], sizes = [1, 256], strides = [1, 1]} : vector<8x256xf32> to vector<1x256xf32>
    %42 = tpu.reciprocal %41 {approx = true} : vector<1x256xf32> -> vector<1x256xf32>
    %43 = vector.extract_strided_slice %40 {offsets = [0, 0], sizes = [2, 256], strides = [1, 1]} : vector<8x256xf32> to vector<2x256xf32>
    %44 = vector.broadcast %42 : vector<1x256xf32> to vector<2x256xf32>
    %45 = arith.mulf %43, %44 : vector<2x256xf32>
    %46 = tpu.concatenate %26, %45 in 0 : vector<2x256xf32>, vector<2x256xf32> -> vector<4x256xf32>
    %47 = vector.broadcast %0 : f32 to vector<4x256xf32>
    %48 = arith.mulf %47, %46 : vector<4x256xf32>
    %49 = arith.addf %48, %2 : vector<4x256xf32>
    %c0_13 = arith.constant 0 : index
    %c0_14 = arith.constant 0 : index
    %c0_15 = arith.constant 0 : index
    %50 = vector.load %arg5[%c0_13, %c0_14, %c0_15] : memref<1x4x256xf32, #tpu.memory_space<vmem>>, vector<1x4x256xf32>
    %51 = vector.shape_cast %50 : vector<1x4x256xf32> to vector<4x256xf32>
    %52 = vector.shape_cast %49 : vector<4x256xf32> to vector<1x4x256xf32>
    tpu.vector_store %arg5[%c0_13, %c0_14, %c0_15], %52 {strides = array<i32>} : memref<1x4x256xf32, #tpu.memory_space<vmem>>, vector<1x4x256xf32>,
    return
  }
  func.func @transform_0(%arg0: i32) -> (i32, i32, i32) {
    %c0_i32 = arith.constant 0 : i32
    %c0_i32_0 = arith.constant 0 : i32
    %c0_i32_1 = arith.constant 0 : i32
    return %arg0, %c0_i32, %c0_i32_0 : i32, i32, i32
  }
  func.func @transform_1(%arg0: i32) -> (i32, i32) {
    %c0_i32 = arith.constant 0 : i32
    %c0_i32_0 = arith.constant 0 : i32
    %c0_i32_1 = arith.constant 0 : i32
    return %c0_i32, %c0_i32_0 : i32, i32
  }
  func.func @transform_2(%arg0: i32) -> (i32, i32) {
    %c0_i32 = arith.constant 0 : i32
    %c0_i32_0 = arith.constant 0 : i32
    %c0_i32_1 = arith.constant 0 : i32
    return %c0_i32, %c0_i32_0 : i32, i32
  }
  func.func @transform_3(%arg0: i32) -> i32 {
    %c0_i32 = arith.constant 0 : i32
    %c0_i32_0 = arith.constant 0 : i32
    return %c0_i32 : i32
  }
  func.func @transform_4(%arg0: i32) -> (i32, i32, i32) {
    %c0_i32 = arith.constant 0 : i32
    %c0_i32_0 = arith.constant 0 : i32
    %c0_i32_1 = arith.constant 0 : i32
    return %arg0, %c0_i32, %c0_i32_0 : i32, i32, i32
  }
}

</mosaic_0001>

<bundles_post_ra>
// kernel: tpu_custom_call.1
= control target key start
LH: loop header
LB: loop body
LE: loop exit
PB: predicated region body
PF: predicated region fallthrough
CT: control target
= control target key end

     0   :  { %s2988_s0 = inlined_call_operand.vmem [shape: f32[2,4,256], index: 0, kind: input, shape index: {}]   ;;  %s2989_s1 = inlined_call_operand.vmem [shape: f32[48,4], index: 1, kind: input, shape index: {}]   ;;  %s2990_s2 = inlined_call_operand.vmem [shape: f32[48,1], index: 2, kind: input, shape index: {}]   ;;  %s2991_s3 = inlined_call_operand.<no memory space> [shape: f32[1], index: 3, kind: input, shape index: {}]   ;;  %s2992_s4 = inlined_call_operand.hbm [shape: f32[2,4,256], index: 4, kind: output, shape index: {}]  }
   0x1   :  { %9 = sst [smem:[#allocation2]] %s2991_s3 }
   0x2   :  { %10 = vsyncpa [#allocation4], 0 }
   0x3   :  { %12 = vsyncpa [#allocation4 + $0x1], 0  ;;  %s2238_s17 = smov 0   ;;  %s2240_s18 = smov 0  }
   0x4   :  { %s2242_s19 = smov 0   ;;  %s2244_s20 = smov 0  }
   0x5 LB: > { %s2259_s3 = sadd.s32 4294967295, %s2205_s20   ;;  %s1780_s21 = sadd.s32 4294967294, %s2205_s20   ;;  %s2205_s20 = sphi %s2244_s20, %s3186_s20   ;;  %s2201_s19 = sphi %s2242_s19, %s3185_s19   ;;  %s2197_s18 = sphi %s2240_s18, %s3184_s18   ;;  %s2193_s17 = sphi %s2238_s17, %s3183_s17  }
   0x6   : > { %s2263_s22 = sadd.s32 1, %s2205_s20   ;;  %s114_s23 = sadd.s32 1, %s2201_s19 }
   0x7   : > { %s111_s24 = ssub.s32 %s2205_s20, %s2263_s22  ;;  %p124_p0 = scmp.ne.s32.totalorder %s2201_s19, %s2197_s18 }
   0x8   : > { %p112_p1 = scmp.eq.s32.totalorder %s111_s24, 0  ;;  %p125_p2 = scmp.eq.s32.totalorder %s2259_s3, 1 }
   0x9   : > { %p130_p3 = scmp.ne.s32.totalorder %s2197_s18, %s2193_s17  ;;  %p131_p4 = scmp.eq.s32.totalorder %s1780_s21, 1 }
   0xa   : > { %s2274_s25 = scalar_select %p112_p1, %s2201_s19, %s114_s23  }
   0xb   : > { %p2276_p5 = por %p125_p2, %p124_p0  ;;  %p2280_p6 = por %p131_p4, %p130_p3 }
   0xc   : > { %p1783_p7 = scmp.ge.s32.totalorder %s2205_s20, 1  ;;  %p166_p8 = scmp.lt.s32.totalorder %s2205_s20, 3 }
   0xe   : > { %p167_p9 = pnand %p1783_p7, %p166_p8 }
  0x10   : > { %170 = sbr.rel (%p167_p9) target bundleno = 1276 (0x4fc), region = 36 }
  0x15   : > { %p192_p10 = scmp.lt.s32.totalorder %s2259_s3, 1  ;;  %v2207_v0 = vmov 0.0   ;;  %v206_v1 = vld [vmem:[%s2990_s2] sm:$0xff]  ;;  %v2208_v2 = vmov 0   ;;  %v207_v3 = vld [vmem:[%s2990_s2 + $0x8] sm:$0xff]  ;;  %vm263_vm0 = vcmask 1043456  }
  0x16   : > { %332 = vmatprep.mubr.f32.mxu0 %v2207_v0  ;;  %1877 = vset.pattern.permute.xlu0 %v2208_v2  ;;  %v200_v6 = vld [vmem:[%s2989_s1] sm:$0xff]  ;;  %vm244_vm1 = vcmask 31744   ;;  %v201_v7 = vld [vmem:[%s2989_s1 + $0x8] sm:$0xff]  ;;  %v202_v8 = vld [vmem:[%s2989_s1 + $0x10] sm:$0xff]  ;;  %vm405_vm2 = vcmask 64512   ;;  %s198_s14 = sld [smem:[#allocation2]] }
  0x17   : > { %s193_s30 = scalar_select %p192_p10, %s2259_s3, 1  ;;  %492 = vmatprep.mubr.bf16.mxu1 %v2208_v2  ;;  %214 = vperm.xlu0 %1877, %v206_v1   ;;  %v203_v9 = vld [vmem:[%s2989_s1 + $0x18] sm:$0xff]  ;;  %v204_v10 = vld [vmem:[%s2989_s1 + $0x20] sm:$0xff]  ;;  %vm1692_vm3 = vcmask 1041408  }
  0x18   : > { %v209_v26 = vld [vmem:[%s2990_s2 + $0x18] sm:$0xff]  ;;  %v210_v27 = vld [vmem:[%s2990_s2 + $0x20] sm:$0xff]  ;;  %s189_s15 = sand.u32 1, %s2197_s18   ;;  %s1835_s21 = sshll.u32 %s2259_s3, 7 }
  0x19   : > { %s1834_s5 = sshll.u32 %s193_s30, 3  ;;  %s1784_s16 = sshll.u32 %s189_s15, 3 }
  0x1a   : > { %s2299_s10 = scalar_lea.vmem %s2988_s0, %s1834_s5  ;;  %s191_s23 = scalar_lea.vmem [#allocation3], %s1784_s16 }
  0x1b   : > { %v199_v4 = vld [vmem:[%s2299_s10] sm:$0xff]  ;;  %219 = vperm.xlu0 %1877, %v207_v3   ;;  %s1721_s24 = sshll.u32 %s191_s23, 4  ;;  %s1719_s30 = scalar_lea.hbm %s2992_s4, %s1835_s21  ;;  %s1722_s24 = int_to_ptr.vmem [resolvable:$true] %s1721_s24 }
  0x1c   : > { %v2302_v5 = vcombine.high %v199_v4, %v199_v4  ;;  %s1707_s5 = scalar_lea.sflag [#allocation4], %s189_s15  ;;  %s2145_s6 = scalar_lea.vmem %s1722_s24, 128 }
  0x1d   : > { %p2146_p11 = scmp.ne.s32.totalorder %s1722_s24, %s2145_s6  ;;  %s2209_s3 = smov [#allocation3]  }
  0x1e   : > { %3055 = vst [vmem:[#allocation6_spill] sm:$0xff] %v2302_v5  ;;  %1787 = vmatprep.subr.msk.mxu0 %vm263_vm0, %v2302_v5  ;;  %s2149_s7 = sshll.u32 %s2209_s3, 4  ;;  %s2150_s7 = int_to_ptr.vmem [resolvable:$false] %s2149_s7 }
  0x1f   : > { %1788 = vmatpush1.msk.msra.mxu0 %vm263_vm0, %v199_v4  ;;  %p2147_p12 = pnand %p2146_p11, %p2276_p5  ;;  %p2152_p0 = scmp.lt.s32.totalorder %s1722_s24, %s2150_s7 }
  0x20   : > { %1789 = vmatmul.mubr.msk.f32.vlgmr.msra.gmra.mxu0 %vm244_vm1, %v200_v6 }
  0x21   : > { %338 = vmatprep.mubr.f32.mxu0 %v2207_v0  ;;  %p2148_p13 = pneg %p2147_p12 }
  0x24   : > { %1790 = vmatmul.mubr.msk.f32.gmra.mxu0 %vm244_vm1, %v201_v7 }
  0x25   : > { %344 = vmatprep.mubr.f32.mxu0 %v2207_v0 }
  0x28   : > { %1791 = vmatmul.mubr.msk.f32.gmra.mxu0 %vm244_vm1, %v202_v8 }
  0x29   : > { %350 = vmatprep.mubr.f32.mxu0 %v2207_v0 }
  0x2c   : > { %1792 = vmatmul.mubr.msk.f32.gmra.mxu0 %vm244_vm1, %v203_v9 }
  0x2d   : > { %356 = vmatprep.mubr.f32.mxu0 %v2207_v0 }
  0x30   : > { %1793 = vmatmul.mubr.msk.f32.gmra.mxu0 %vm244_vm1, %v204_v10 }
  0x31   : > { %362 = vmatprep.mubr.f32.mxu0 %v2207_v0 }
  0x92   : > { %v215_v11 = vpop.permute.xlu0 %214 }
  0x96   : > { %v220_v17 = vpop.permute.xlu0 %219 }
  0xe0   : > { %v334_v12 = vpop.f32.mrf.mxu0 }
  0xe1   : > { %v335_v13 = vadd.f32 %v334_v12, %v215_v11 }
  0xe2   : > { %v336_v14 = vpop.f32.mrf.mxu0 }
  0xe3   : > { %v337_v15 = vadd.f32 %v336_v14, %v215_v11  ;;  %v369_v16 = vpack.c.bf16 %v335_v13, %v335_v13 }
  0xe4   : > { %v340_v18 = vpop.f32.mrf.mxu0 }
  0xe5   : > { %v370_v19 = vpack.c.bf16 %v337_v15, %v337_v15  ;;  %v341_v20 = vadd.f32 %v340_v18, %v220_v17  ;;  %373 = vxpose.xlu1.c.b16.start.end [1/1] (short) %v369_v16, 128 }
  0xe6   : > { %v342_v21 = vpop.f32.mrf.mxu0 }
  0xe7   : > { %v371_v22 = vpack.c.bf16 %v341_v20, %v341_v20  ;;  %v343_v23 = vadd.f32 %v342_v21, %v220_v17  ;;  %389 = vxpose.xlu0.c.b16.start.end [1/1] (short) %v370_v19, 128 }
  0xe8   : > { %v2346_v34 = vpop.f32.mrf.mxu0 }
  0xe9   : > { %v372_v24 = vpack.c.bf16 %v343_v23, %v343_v23  ;;  %1878 = vset.pattern.permute.xlu1 %v2208_v2  ;;  %v455_v25 = vsel %vm263_vm0, %v371_v22, 0  ;;  %3056 = vst [vmem:[#allocation7_spill] sm:$0xff] %v2346_v34 }
  0xea   : > { %v2350_v35 = vpop.f32.mrf.mxu0 }
  0xeb   : > { %1795 = vmatprep.subr.msk.bf16.mxu1 %vm263_vm0, %v372_v24  ;;  %3057 = vst [vmem:[#allocation8_spill] sm:$0xff] %v2350_v35 }
  0xec   : > { %475 = vmatpush1.bf16.msra.mxu1 %v455_v25  ;;  %v352_v37 = vpop.f32.mrf.mxu0 }
  0xee   : > { %v354_v39 = vpop.f32.mrf.mxu0 }
  0xf0   : > { %v358_v40 = vpop.f32.mrf.mxu0 }
  0xf2   : > { %v360_v44 = vpop.f32.mrf.mxu0 }
 0x105   : > { %229 = vperm.xlu1 %1878, %v209_v26  }
 0x109   : > { %234 = vperm.xlu1 %1878, %v210_v27  }
 0x147   : > { %v381_v28 = vpop.trf.xlu1 }
 0x148   : > { %1796 = vmatmul.mubr.msk.bf16.vlgmr.msra.gmra.mxu1 %vm405_vm2, %v381_v28 }
 0x149   : > { %502 = vmatprep.mubr.bf16.mxu1 %v2208_v2  ;;  %v397_v50 = vpop.trf.xlu0 }
 0x14b   : > { %v382_v29 = vpop.trf.xlu1 }
 0x14d   : > { %v398_v54 = vpop.trf.xlu0 }
 0x14f   : > { %v383_v30 = vpop.trf.xlu1 }
 0x150   : > { %1797 = vmatmul.mubr.msk.bf16.gmra.mxu1 %vm405_vm2, %v382_v29 }
 0x151   : > { %512 = vmatprep.mubr.bf16.mxu1 %v2208_v2  ;;  %v399_v55 = vpop.trf.xlu0 }
 0x153   : > { %v384_v31 = vpop.trf.xlu1 }
 0x155   : > { %v400_v56 = vpop.trf.xlu0 }
 0x157   : > { %v385_v32 = vpop.trf.xlu1 }
 0x158   : > { %1798 = vmatmul.mubr.msk.bf16.gmra.mxu1 %vm405_vm2, %v383_v30 }
 0x159   : > { %522 = vmatprep.mubr.bf16.mxu1 %v2208_v2  ;;  %v401_v57 = vpop.trf.xlu0 }
 0x15b   : > { %v386_v33 = vpop.trf.xlu1 }
 0x15d   : > { %v402_v58 = vpop.trf.xlu0 }
 0x15f   : > { %v387_v36 = vpop.trf.xlu1 }
 0x160   : > { %1799 = vmatmul.mubr.msk.bf16.gmra.mxu1 %vm405_vm2, %v384_v31 }
 0x161   : > { %532 = vmatprep.mubr.bf16.mxu1 %v2208_v2  ;;  %v403_v59 = vpop.trf.xlu0 }
 0x163   : > { %v388_v38 = vpop.trf.xlu1 }
 0x165   : > { %v404_v60 = vpop.trf.xlu0 }
 0x168   : > { %1800 = vmatmul.mubr.msk.bf16.gmra.mxu1 %vm405_vm2, %v385_v32 }
 0x169   : > { %542 = vmatprep.mubr.bf16.mxu1 %v2208_v2 }
 0x170   : > { %1801 = vmatmul.mubr.msk.bf16.gmra.mxu1 %vm405_vm2, %v386_v33 }
 0x171   : > { %552 = vmatprep.mubr.bf16.mxu1 %v2208_v2 }
 0x178   : > { %1802 = vmatmul.mubr.msk.bf16.gmra.mxu1 %vm405_vm2, %v387_v36 }
 0x179   : > { %562 = vmatprep.mubr.bf16.mxu1 %v2208_v2 }
 0x180   : > { %1803 = vmatmul.mubr.msk.bf16.gmra.mxu1 %vm405_vm2, %v388_v38  ;;  %v230_v41 = vpop.permute.xlu1 %229 }
 0x181   : > { %v353_v42 = vadd.f32 %v352_v37, %v230_v41  ;;  %v355_v43 = vadd.f32 %v354_v39, %v230_v41  ;;  %572 = vmatprep.mubr.bf16.mxu1 %v2208_v2 }
 0x183   : > { %v1028_v45 = vpack.c.bf16 %v353_v42, %v353_v42  ;;  %v1029_v46 = vpack.c.bf16 %v355_v43, %v355_v43 }
 0x184   : > { %v235_v47 = vpop.permute.xlu1 %234 }
 0x185   : > { %v359_v48 = vadd.f32 %v358_v40, %v235_v47  ;;  %v361_v49 = vadd.f32 %v360_v44, %v235_v47  ;;  %1048 = vxpose.xlu1.c.b16.start.end [1/1] (short) %v1029_v46, 128  ;;  %1032 = vxpose.xlu0.c.b16.start.end [1/1] (short) %v1028_v45, 128 }
 0x187   : > { %v1030_v51 = vpack.c.bf16 %v359_v48, %v359_v48  ;;  %v1031_v52 = vpack.c.bf16 %v361_v49, %v361_v49 }
 0x188   : > { %1804 = vmatmul.mubr.msk.bf16.gmra.mxu1 %vm405_vm2, %v397_v50 }
 0x189   : > { %1812 = vmatprep.subr.msk.bf16.mxu1 %vm263_vm0, %v1031_v52  ;;  %v1113_v53 = vsel %vm263_vm0, %v1030_v51, 0  ;;  %582 = vmatprep.mubr.bf16.mxu1 %v2208_v2 }
 0x18a   : > { %1133 = vmatpush1.bf16.msra.mxu1 %v1113_v53 }
 0x190   : > { %1805 = vmatmul.mubr.msk.bf16.gmra.mxu1 %vm405_vm2, %v398_v54 }
 0x191   : > { %592 = vmatprep.mubr.bf16.mxu1 %v2208_v2 }
 0x198   : > { %1806 = vmatmul.mubr.msk.bf16.gmra.mxu1 %vm405_vm2, %v399_v55 }
 0x199   : > { %602 = vmatprep.mubr.bf16.mxu1 %v2208_v2 }
 0x1a0   : > { %1807 = vmatmul.mubr.msk.bf16.gmra.mxu1 %vm405_vm2, %v400_v56 }
 0x1a1   : > { %612 = vmatprep.mubr.bf16.mxu1 %v2208_v2 }
 0x1a8   : > { %1808 = vmatmul.mubr.msk.bf16.gmra.mxu1 %vm405_vm2, %v401_v57 }
 0x1a9   : > { %622 = vmatprep.mubr.bf16.mxu1 %v2208_v2 }
 0x1b0   : > { %1809 = vmatmul.mubr.msk.bf16.gmra.mxu1 %vm405_vm2, %v402_v58 }
 0x1b1   : > { %632 = vmatprep.mubr.bf16.mxu1 %v2208_v2 }
 0x1b8   : > { %1810 = vmatmul.mubr.msk.bf16.gmra.mxu1 %vm405_vm2, %v403_v59 }
 0x1b9   : > { %642 = vmatprep.mubr.bf16.mxu1 %v2208_v2 }
 0x1c0   : > { %1811 = vmatmul.mubr.msk.bf16.gmra.mxu1 %vm405_vm2, %v404_v60 }
 0x1c1   : > { %1150 = vmatprep.mubr.bf16.mxu1 %v2208_v2 }
 0x1e7   : > { %v1040_v61 = vpop.trf.xlu0  ;;  %v1056_v22 = vpop.trf.xlu1 }
 0x1e8   : > { %1813 = vmatmul.mubr.msk.bf16.vlgmr.msra.gmra.mxu1 %vm405_vm2, %v1040_v61 }
 0x1e9   : > { %1160 = vmatprep.mubr.bf16.mxu1 %v2208_v2 }
 0x1eb   : > { %v1041_v62 = vpop.trf.xlu0  ;;  %v1057_v27 = vpop.trf.xlu1 }
 0x1ef   : > { %v1042_v63 = vpop.trf.xlu0  ;;  %v1058_v32 = vpop.trf.xlu1 }
 0x1f0   : > { %1814 = vmatmul.mubr.msk.bf16.gmra.mxu1 %vm405_vm2, %v1041_v62 }
 0x1f1   : > { %1170 = vmatprep.mubr.bf16.mxu1 %v2208_v2 }
 0x1f3   : > { %v1043_v0 = vpop.trf.xlu0  ;;  %v1059_v39 = vpop.trf.xlu1 }
 0x1f7   : > { %v1044_v1 = vpop.trf.xlu0  ;;  %v1060_v45 = vpop.trf.xlu1 }
 0x1f8   : > { %1815 = vmatmul.mubr.msk.bf16.gmra.mxu1 %vm405_vm2, %v1042_v63 }
 0x1f9   : > { %1180 = vmatprep.mubr.bf16.mxu1 %v2208_v2 }
 0x1fb   : > { %v1045_v7 = vpop.trf.xlu0  ;;  %v1061_v54 = vpop.trf.xlu1 }
 0x1ff   : > { %v1046_v12 = vpop.trf.xlu0  ;;  %v1062_v63 = vpop.trf.xlu1 }
 0x200   : > { %1816 = vmatmul.mubr.msk.bf16.gmra.mxu1 %vm405_vm2, %v1043_v0 }
 0x201   : > { %1190 = vmatprep.mubr.bf16.mxu1 %v2208_v2 }
 0x203   : > { %v1047_v17 = vpop.trf.xlu0 }
 0x208   : > { %v2382_v3 = vpop.f32.mrf.mxu1  ;;  %1817 = vmatmul.mubr.msk.bf16.gmra.mxu1 %vm405_vm2, %v1044_v1 }
 0x209   : > { %3058 = vst [vmem:[#allocation9_spill] sm:$0xff] %v2382_v3  ;;  %1200 = vmatprep.mubr.bf16.mxu1 %v2208_v2 }
 0x20a   : > { %v2386_v4 = vpop.f32.mrf.mxu1 }
 0x20b   : > { %3059 = vst [vmem:[#allocation10_spill] sm:$0xff] %v2386_v4 }
 0x20c   : > { %v2388_v6 = vpop.f32.mrf.mxu1 }
 0x20d   : > { %3060 = vst [vmem:[#allocation11_spill] sm:$0xff] %v2388_v6 }
 0x20e   : > { %v2390_v8 = vpop.f32.mrf.mxu1 }
 0x20f   : > { %3061 = vst [vmem:[#allocation12_spill] sm:$0xff] %v2390_v8 }
 0x210   : > { %v2392_v9 = vpop.f32.mrf.mxu1  ;;  %1818 = vmatmul.mubr.msk.bf16.gmra.mxu1 %vm405_vm2, %v1045_v7 }
 0x211   : > { %1210 = vmatprep.mubr.bf16.mxu1 %v2208_v2 }
 0x212   : > { %v2396_v10 = vpop.f32.mrf.mxu1 }
 0x214   : > { %v2398_v11 = vpop.f32.mrf.mxu1 }
 0x215   : > { %3062 = vst [vmem:[#allocation13_spill] sm:$0xff] %v2398_v11 }
 0x216   : > { %v2400_v13 = vpop.f32.mrf.mxu1 }
 0x218   : > { %v2402_v14 = vpop.f32.mrf.mxu1  ;;  %1819 = vmatmul.mubr.msk.bf16.gmra.mxu1 %vm405_vm2, %v1046_v12 }
 0x219   : > { %1220 = vmatprep.mubr.bf16.mxu1 %v2208_v2 }
 0x21a   : > { %v2406_v15 = vpop.f32.mrf.mxu1 }
 0x21c   : > { %v2408_v16 = vpop.f32.mrf.mxu1 }
 0x21e   : > { %v2410_v18 = vpop.f32.mrf.mxu1 }
 0x21f   : > { %v668_v1 = vmax.f32 %v2408_v16, %v2410_v18 }
 0x220   : > { %v2412_v19 = vpop.f32.mrf.mxu1  ;;  %1820 = vmatmul.mubr.msk.bf16.gmra.mxu1 %vm405_vm2, %v1047_v17 }
 0x221   : > { %1230 = vmatprep.mubr.bf16.mxu1 %v2208_v2 }
 0x222   : > { %v2416_v20 = vpop.f32.mrf.mxu1 }
 0x223   : > { %v671_v7 = vmax.f32 %v2412_v19, %v2416_v20 }
 0x224   : > { %v2418_v21 = vpop.f32.mrf.mxu1 }
 0x226   : > { %v2420_v23 = vpop.f32.mrf.mxu1 }
 0x227   : > { %v674_v60 = vmax.f32 %v2418_v21, %v2420_v23 }
 0x228   : > { %v2422_v24 = vpop.f32.mrf.mxu1  ;;  %1821 = vmatmul.mubr.msk.bf16.gmra.mxu1 %vm405_vm2, %v1056_v22  ;;  %v662_v22 = vmax.f32 %v2398_v11, %v2400_v13 }
 0x229   : > { %1240 = vmatprep.mubr.bf16.mxu1 %v2208_v2 }
 0x22a   : > { %v2426_v25 = vpop.f32.mrf.mxu1 }
 0x22b   : > { %v677_v61 = vmax.f32 %v2422_v24, %v2426_v25 }
 0x22c   : > { %v2428_v26 = vpop.f32.mrf.mxu1 }
 0x22e   : > { %v2430_v28 = vpop.f32.mrf.mxu1 }
 0x22f   : > { %v680_v56 = vmax.f32 %v2428_v26, %v2430_v28 }
 0x230   : > { %v2432_v29 = vpop.f32.mrf.mxu1  ;;  %1822 = vmatmul.mubr.msk.bf16.gmra.mxu1 %vm405_vm2, %v1057_v27  ;;  %v665_v27 = vmax.f32 %v2402_v14, %v2406_v15 }
 0x231   : > { %1250 = vmatprep.mubr.bf16.mxu1 %v2208_v2 }
 0x232   : > { %v2436_v30 = vpop.f32.mrf.mxu1 }
 0x233   : > { %v683_v57 = vmax.f32 %v2432_v29, %v2436_v30 }
 0x234   : > { %v2438_v31 = vpop.f32.mrf.mxu1 }
 0x236   : > { %v2440_v33 = vpop.f32.mrf.mxu1 }
 0x237   : > { %v686_v51 = vmax.f32 %v2438_v31, %v2440_v33 }
 0x238   : > { %v2442_v36 = vpop.f32.mrf.mxu1  ;;  %1823 = vmatmul.mubr.msk.bf16.gmra.mxu1 %vm405_vm2, %v1058_v32 }
 0x239   : > { %1260 = vmatprep.mubr.bf16.mxu1 %v2208_v2 }
 0x23a   : > { %v2446_v37 = vpop.f32.mrf.mxu1 }
 0x23b   : > { %v689_v48 = vmax.f32 %v2442_v36, %v2446_v37 }
 0x23c   : > { %v2448_v38 = vpop.f32.mrf.mxu1 }
 0x23e   : > { %v2450_v40 = vpop.f32.mrf.mxu1 }
 0x23f   : > { %v692_v52 = vmax.f32 %v2448_v38, %v2450_v40 }
 0x240   : > { %v2452_v41 = vpop.f32.mrf.mxu1  ;;  %1824 = vmatmul.mubr.msk.bf16.gmra.mxu1 %vm405_vm2, %v1059_v39  ;;  %v1063_v39 = vpop.trf.xlu1 }
 0x241   : > { %1270 = vmatprep.mubr.bf16.mxu1 %v2208_v2 }
 0x242   : > { %v2456_v42 = vpop.f32.mrf.mxu1 }
 0x243   : > { %v695_v43 = vmax.f32 %v2452_v41, %v2456_v42 }
 0x244   : > { %v2460_v44 = vpop.f32.mrf.mxu1 }
 0x245   : > { %696 = vmax.xlane.f32.xlu0 %v695_v43 }
 0x246   : > { %v2462_v46 = vpop.f32.mrf.mxu1 }
 0x247   : > { %v698_v47 = vmax.f32 %v2460_v44, %v2462_v46 }
 0x248   : > { %v2468_v49 = vpop.f32.mrf.mxu1  ;;  %1825 = vmatmul.mubr.msk.bf16.gmra.mxu1 %vm405_vm2, %v1060_v45  ;;  %v656_v45 = vmax.f32 %v2388_v6, %v2390_v8 }
 0x249   : > { %3063 = vst [vmem:[#allocation14_spill] sm:$0xff] %v2468_v49  ;;  %699 = vmax.xlane.f32.xlu1 %v698_v47  ;;  %690 = vmax.xlane.f32.xlu0 %v689_v48  ;;  %v659_v47 = vmax.f32 %v2392_v9, %v2396_v10 }
 0x24a   : > { %v2471_v50 = vpop.f32.mrf.mxu1  ;;  %1280 = vmatprep.mubr.bf16.mxu1 %v2208_v2 }
 0x24b   : > { %3064 = vst [vmem:[#allocation15_spill] sm:$0xff] %v2471_v50 }
 0x24c   : > { %v2478_v53 = vpop.f32.mrf.mxu1 }
 0x24d   : > { %3065 = vst [vmem:[#allocation16_spill] sm:$0xff] %v2478_v53  ;;  %687 = vmax.xlane.f32.xlu1 %v686_v51  ;;  %693 = vmax.xlane.f32.xlu0 %v692_v52  ;;  %v653_v51 = vmax.f32 %v2382_v3, %v2386_v4 }
 0x24e   : > { %v2480_v55 = vpop.f32.mrf.mxu1 }
 0x24f   : > { %3066 = vst [vmem:[#allocation17_spill] sm:$0xff] %v2480_v55 }
 0x250   : > { %v2486_v58 = vpop.f32.mrf.mxu1  ;;  %1826 = vmatmul.mubr.msk.bf16.gmra.mxu1 %vm405_vm2, %v1061_v54 }
 0x251   : > { %3067 = vst [vmem:[#allocation18_spill] sm:$0xff] %v2486_v58  ;;  %681 = vmax.xlane.f32.xlu1 %v680_v56  ;;  %684 = vmax.xlane.f32.xlu0 %v683_v57 }
 0x252   : > { %v2489_v59 = vpop.f32.mrf.mxu1  ;;  %1290 = vmatprep.mubr.bf16.mxu1 %v2208_v2 }
 0x253   : > { %3068 = vst [vmem:[#allocation19_spill] sm:$0xff] %v2489_v59 }
 0x254   : > { %v2496_v62 = vpop.f32.mrf.mxu1 }
 0x255   : > { %3069 = vst [vmem:[#allocation20_spill] sm:$0xff] %v2496_v62  ;;  %675 = vmax.xlane.f32.xlu1 %v674_v60  ;;  %678 = vmax.xlane.f32.xlu0 %v677_v61 }
 0x256   : > { %v2498_v0 = vpop.f32.mrf.mxu1 }
 0x257   : > { %3070 = vst [vmem:[#allocation21_spill] sm:$0xff] %v2498_v0 }
 0x258   : > { %v2504_v12 = vpop.f32.mrf.mxu1  ;;  %1827 = vmatmul.mubr.msk.bf16.gmra.mxu1 %vm405_vm2, %v1062_v63 }
 0x259   : > { %3071 = vst [vmem:[#allocation22_spill] sm:$0xff] %v2504_v12  ;;  %669 = vmax.xlane.f32.xlu1 %v668_v1  ;;  %672 = vmax.xlane.f32.xlu0 %v671_v7 }
 0x25a   : > { %v2507_v17 = vpop.f32.mrf.mxu1  ;;  %1300 = vmatprep.mubr.bf16.mxu1 %v2208_v2 }
 0x25b   : > { %3072 = vst [vmem:[#allocation23_spill] sm:$0xff] %v2507_v17 }
 0x25c   : > { %v2514_v32 = vpop.f32.mrf.mxu1 }
 0x25d   : > { %3073 = vst [vmem:[#allocation24_spill] sm:$0xff] %v2514_v32  ;;  %663 = vmax.xlane.f32.xlu1 %v662_v22  ;;  %666 = vmax.xlane.f32.xlu0 %v665_v27 }
 0x25e   : > { %v2516_v43 = vpop.f32.mrf.mxu1 }
 0x25f   : > { %3074 = vst [vmem:[#allocation25_spill] sm:$0xff] %v2516_v43 }
 0x260   : > { %v2522_v2 = vpop.f32.mrf.mxu1  ;;  %1828 = vmatmul.mubr.msk.bf16.gmra.mxu1 %vm405_vm2, %v1063_v39 }
 0x261   : > { %3075 = vst [vmem:[#allocation26_spill] sm:$0xff] %v2522_v2  ;;  %657 = vmax.xlane.f32.xlu1 %v656_v45  ;;  %660 = vmax.xlane.f32.xlu0 %v659_v47 }
 0x262   : > { %v2525_v48 = vpop.f32.mrf.mxu1 }
 0x263   : > { %3076 = vst [vmem:[#allocation27_spill] sm:$0xff] %v2525_v48 }
 0x264   : > { %v2529_v52 = vpop.f32.mrf.mxu1 }
 0x265   : > { %3077 = vst [vmem:[#allocation28_spill] sm:$0xff] %v2529_v52  ;;  %654 = vmax.xlane.f32.xlu0 %v653_v51 }
 0x266   : > { %v2531_v54 = vpop.f32.mrf.mxu1 }
 0x267   : > { %3078 = vst [vmem:[#allocation29_spill] sm:$0xff] %v2531_v54 }
 0x268   : > { %v2533_v56 = vpop.f32.mrf.mxu1 }
 0x269   : > { %3079 = vst [vmem:[#allocation30_spill] sm:$0xff] %v2533_v56 }
 0x26a   : > { %v2535_v57 = vpop.f32.mrf.mxu1 }
 0x26b   : > { %3080 = vst [vmem:[#allocation31_spill] sm:$0xff] %v2535_v57 }
 0x26c   : > { %v2537_v60 = vpop.f32.mrf.mxu1 }
 0x26d   : > { %3081 = vst [vmem:[#allocation32_spill] sm:$0xff] %v2537_v60 }
 0x26e   : > { %v2539_v61 = vpop.f32.mrf.mxu1 }
 0x26f   : > { %3082 = vst [vmem:[#allocation33_spill] sm:$0xff] %v2539_v61 }
 0x270   : > { %v2541_v63 = vpop.f32.mrf.mxu1 }
 0x271   : > { %3083 = vst [vmem:[#allocation34_spill] sm:$0xff] %v2541_v63 }
 0x272   : > { %v2543_v1 = vpop.f32.mrf.mxu1 }
 0x273   : > { %3084 = vst [vmem:[#allocation35_spill] sm:$0xff] %v2543_v1  ;;  %v731_v4 = vmax.f32 %v2541_v63, %v2543_v1 }
 0x274   : > { %v2545_v7 = vpop.f32.mrf.mxu1 }
 0x275   : > { %3085 = vst [vmem:[#allocation36_spill] sm:$0xff] %v2545_v7 }
 0x276   : > { %v2547_v22 = vpop.f32.mrf.mxu1 }
 0x277   : > { %3086 = vst [vmem:[#allocation37_spill] sm:$0xff] %v2547_v22 }
 0x278   : > { %v2549_v27 = vpop.f32.mrf.mxu1 }
 0x279   : > { %3087 = vst [vmem:[#allocation38_spill] sm:$0xff] %v2549_v27 }
 0x27a   : > { %v2551_v39 = vpop.f32.mrf.mxu1 }
 0x27b   : > { %3088 = vst [vmem:[#allocation39_spill] sm:$0xff] %v2551_v39  ;;  %v737_v6 = vmax.f32 %v2549_v27, %v2551_v39  ;;  %v725_v27 = vmax.f32 %v2533_v56, %v2535_v57  ;;  %v713_v56 = vmax.f32 %v2504_v12, %v2507_v17 }
 0x27c   : > { %v2553_v45 = vpop.f32.mrf.mxu1 }
 0x27d   : > { %3089 = vst [vmem:[#allocation40_spill] sm:$0xff] %v2553_v45 }
 0x27e   : > { %v2555_v47 = vpop.f32.mrf.mxu1 }
 0x27f   : > { %3090 = vst [vmem:[#allocation41_spill] sm:$0xff] %v2555_v47  ;;  %v740_v11 = vmax.f32 %v2553_v45, %v2555_v47 }
 0x280   : > { %v2557_v51 = vpop.f32.mrf.mxu1 }
 0x282   : > { %v2559_v5 = vpop.f32.mrf.mxu1 }
 0x283   : > { %v743_v35 = vmax.f32 %v2557_v51, %v2559_v5 }
 0x284   : > { %v2563_v34 = vpop.f32.mrf.mxu1 }
 0x285   : > { %744 = vmax.xlane.f32.xlu0 %v743_v35  ;;  %v734_v35 = vmax.f32 %v2545_v7, %v2547_v22 }
 0x286   : > { %v2567_v3 = vpop.f32.mrf.mxu1 }
 0x287   : > { %3091 = vst [vmem:[#allocation42_spill] sm:$0xff] %v2567_v3  ;;  %v746_v8 = vmax.f32 %v2563_v34, %v2567_v3 }
 0x289   : > { %747 = vmax.xlane.f32.xlu1 %v746_v8  ;;  %738 = vmax.xlane.f32.xlu0 %v737_v6  ;;  %v728_v8 = vmax.f32 %v2537_v60, %v2539_v61  ;;  %v719_v6 = vmax.f32 %v2522_v2, %v2525_v48 }
 0x28d   : > { %741 = vmax.xlane.f32.xlu1 %v740_v11  ;;  %732 = vmax.xlane.f32.xlu0 %v731_v4  ;;  %v205_v4 = vld [vmem:[%s2989_s1 + $0x28] sm:$0xff]  ;;  %v722_v11 = vmax.f32 %v2529_v52, %v2531_v54 }
 0x28e   : > { %1794 = vmatmul.mubr.msk.f32.gmra.mxu0 %vm244_vm1, %v205_v4  ;;  %v704_v4 = vmax.f32 %v2478_v53, %v2480_v55 }
 0x291   : > { %735 = vmax.xlane.f32.xlu1 %v734_v35  ;;  %726 = vmax.xlane.f32.xlu0 %v725_v27  ;;  %v716_v27 = vmax.f32 %v2514_v32, %v2516_v43  ;;  %v707_v35 = vmax.f32 %v2486_v58, %v2489_v59 }
 0x295   : > { %729 = vmax.xlane.f32.xlu1 %v728_v8  ;;  %720 = vmax.xlane.f32.xlu0 %v719_v6  ;;  %v710_v8 = vmax.f32 %v2496_v62, %v2498_v0  ;;  %v701_v6 = vmax.f32 %v2468_v49, %v2471_v50 }
 0x299   : > { %723 = vmax.xlane.f32.xlu1 %v722_v11  ;;  %714 = vmax.xlane.f32.xlu0 %v713_v56 }
 0x29d   : > { %717 = vmax.xlane.f32.xlu1 %v716_v27  ;;  %708 = vmax.xlane.f32.xlu0 %v707_v35 }
 0x2a1   : > { %711 = vmax.xlane.f32.xlu1 %v710_v8  ;;  %702 = vmax.xlane.f32.xlu0 %v701_v6 }
 0x2a5   : > { %705 = vmax.xlane.f32.xlu1 %v704_v4 }
 0x2a8   : > { %v2601_v56 = vpop.f32.mrf.mxu1 }
 0x2a9   : > { %3092 = vst [vmem:[#allocation43_spill] sm:$0xff] %v2601_v56 }
 0x2aa   : > { %v2603_v11 = vpop.f32.mrf.mxu1 }
 0x2ab   : > { %3093 = vst [vmem:[#allocation44_spill] sm:$0xff] %v2603_v11 }
 0x2ac   : > { %v2605_v12 = vpop.f32.mrf.mxu1 }
 0x2ad   : > { %3094 = vst [vmem:[#allocation45_spill] sm:$0xff] %v2605_v12 }
 0x2ae   : > { %v2607_v27 = vpop.f32.mrf.mxu1 }
 0x2af   : > { %3095 = vst [vmem:[#allocation46_spill] sm:$0xff] %v2607_v27 }
 0x2b0   : > { %v2609_v35 = vpop.f32.mrf.mxu1 }
 0x2b1   : > { %3096 = vst [vmem:[#allocation47_spill] sm:$0xff] %v2609_v35 }
 0x2b2   : > { %v2611_v58 = vpop.f32.mrf.mxu1 }
 0x2b3   : > { %3097 = vst [vmem:[#allocation48_spill] sm:$0xff] %v2611_v58 }
 0x2b4   : > { %v2613_v62 = vpop.f32.mrf.mxu1 }
 0x2b5   : > { %3098 = vst [vmem:[#allocation49_spill] sm:$0xff] %v2613_v62 }
 0x2b6   : > { %v2615_v8 = vpop.f32.mrf.mxu1 }
 0x2b7   : > { %3099 = vst [vmem:[#allocation50_spill] sm:$0xff] %v2615_v8 }
 0x2b8   : > { %v2617_v6 = vpop.f32.mrf.mxu1 }
 0x2b9   : > { %3100 = vst [vmem:[#allocation51_spill] sm:$0xff] %v2617_v6 }
 0x2ba   : > { %v2619_v49 = vpop.f32.mrf.mxu1 }
 0x2bb   : > { %3101 = vst [vmem:[#allocation52_spill] sm:$0xff] %v2619_v49 }
 0x2bc   : > { %v2621_v4 = vpop.f32.mrf.mxu1 }
 0x2bd   : > { %3102 = vst [vmem:[#allocation53_spill] sm:$0xff] %v2621_v4 }
 0x2be   : > { %v2623_v53 = vpop.f32.mrf.mxu1 }
 0x2bf   : > { %3103 = vst [vmem:[#allocation54_spill] sm:$0xff] %v2623_v53 }
 0x2c0   : > { %v2625_v50 = vpop.f32.mrf.mxu1 }
 0x2c1   : > { %3104 = vst [vmem:[#allocation55_spill] sm:$0xff] %v2625_v50 }
 0x2c2   : > { %v2627_v55 = vpop.f32.mrf.mxu1 }
 0x2c3   : > { %3105 = vst [vmem:[#allocation56_spill] sm:$0xff] %v2627_v55 }
 0x2c4   : > { %v2629_v59 = vpop.f32.mrf.mxu1 }
 0x2c5   : > { %3106 = vst [vmem:[#allocation57_spill] sm:$0xff] %v2629_v59 }
 0x2c6   : > { %v2631_v0 = vpop.f32.mrf.mxu1 }
 0x2c7   : > { %3107 = vst [vmem:[#allocation58_spill] sm:$0xff] %v2631_v0 }
 0x2c8   : > { %v2633_v32 = vpop.f32.mrf.mxu1 }
 0x2c9   : > { %3108 = vst [vmem:[#allocation59_spill] sm:$0xff] %v2633_v32 }
 0x2ca   : > { %v2635_v17 = vpop.f32.mrf.mxu1 }
 0x2cc   : > { %v2637_v2 = vpop.f32.mrf.mxu1 }
 0x2ce   : > { %v697_v43 = vpop.xlane.xlu0 %696  ;;  %v2639_v52 = vpop.f32.mrf.mxu1 }
 0x2cf   : > { %v777_v48 = vsub.f32 %v2452_v41, %v697_v43  ;;  %v778_v54 = vsub.f32 %v2456_v42, %v697_v43 }
 0x2d0   : > { %v2643_v60 = vpop.f32.mrf.mxu1 }
 0x2d1   : > { %v869_v61 = vmul.f32 1.442695, %v777_v48  ;;  %v871_v7 = vmul.f32 1.442695, %v778_v54 }
 0x2d2   : > { %v691_v57 = vpop.xlane.xlu0 %690  ;;  %v2645_v63 = vpop.f32.mrf.mxu1 }
 0x2d3   : > { %v774_v35 = vsub.f32 %v2446_v37, %v691_v57  ;;  %v700_v58 = vpop.xlane.xlu1 %699  ;;  %1880 = vpow2.f32 %v869_v61 }
 0x2d4   : > { %v779_v22 = vsub.f32 %v2460_v44, %v700_v58  ;;  %v780_v1 = vsub.f32 %v2462_v46, %v700_v58  ;;  %v2650_v45 = vpop.f32.mrf.mxu1  ;;  %1882 = vpow2.f32 %v871_v7 }
 0x2d5   : > { %v863_v43 = vmul.f32 1.442695, %v774_v35 }
 0x2d6   : > { %v873_v47 = vmul.f32 1.442695, %v779_v22  ;;  %v875_v41 = vmul.f32 1.442695, %v780_v1  ;;  %v694_v12 = vpop.xlane.xlu0 %693  ;;  %v2652_v42 = vpop.f32.mrf.mxu1  ;;  %v773_v1 = vsub.f32 %v2442_v36, %v691_v57 }
 0x2d7   : > { %v776_v27 = vsub.f32 %v2450_v40, %v694_v12  ;;  %v775_v37 = vsub.f32 %v2448_v38, %v694_v12  ;;  %v688_v54 = vpop.xlane.xlu1 %687 }
 0x2d8   : > { %v2655_v48 = vpop.f32.mrf.mxu1  ;;  %1884 = vpow2.f32 %v873_v47  ;;  %v772_v40 = vsub.f32 %v2440_v33, %v688_v54  ;;  %v861_v38 = vmul.f32 1.442695, %v773_v1  ;;  %v771_v33 = vsub.f32 %v2438_v31, %v688_v54 }
 0x2d9   : > { %v867_v44 = vmul.f32 1.442695, %v776_v27  ;;  %1886 = vpow2.f32 %v875_v41  ;;  %v865_v22 = vmul.f32 1.442695, %v775_v37 }
 0x2da   : > { %v685_v46 = vpop.xlane.xlu0 %684  ;;  %v2658_v58 = vpop.f32.mrf.mxu1  ;;  %1888 = vpow2.f32 %v863_v43  ;;  %v859_v27 = vmul.f32 1.442695, %v772_v40 }
 0x2db   : > { %v770_v61 = vsub.f32 %v2436_v30, %v685_v46  ;;  %1890 = vpow2.f32 %v867_v44  ;;  %v769_v36 = vsub.f32 %v2432_v29, %v685_v46  ;;  %v682_v57 = vpop.xlane.xlu1 %681  ;;  %v1347_v54 = vmax.f32 %v2655_v48, %v2658_v58 }
 0x2dc   : > { %v2663_v7 = vpop.f32.mrf.mxu1  ;;  %1892 = vpow2.f32 %v865_v22  ;;  %v768_v1 = vsub.f32 %v2430_v28, %v682_v57 }
 0x2dd   : > { %v855_v47 = vmul.f32 1.442695, %v770_v61  ;;  %v853_v29 = vmul.f32 1.442695, %v769_v36 }
 0x2de   : > { %v2665_v35 = vpop.f32.mrf.mxu1  ;;  %v679_v12 = vpop.xlane.xlu0 %678 }
 0x2df   : > { %1894 = vpow2.f32 %v855_v47  ;;  %v766_v30 = vsub.f32 %v2426_v25, %v679_v12  ;;  %v765_v36 = vsub.f32 %v2422_v24, %v679_v12  ;;  %v1341_v24 = vmax.f32 %v2643_v60, %v2645_v63 }
 0x2e0   : > { %v2667_v41 = vpop.f32.mrf.mxu1  ;;  %1896 = vpow2.f32 %v861_v38  ;;  %v1881_v44 = vpop.eup %1880  ;;  %v857_v38 = vmul.f32 1.442695, %v771_v33 }
 0x2e1   : > { %3109 = vst [vmem:[#allocation60_spill] sm:$0xff] %v2667_v41  ;;  %1898 = vpow2.f32 %v859_v27  ;;  %v1883_v40 = vpop.eup %1882  ;;  %v847_v22 = vmul.f32 1.442695, %v766_v30  ;;  %v851_v27 = vmul.f32 1.442695, %v768_v1  ;;  %v767_v1 = vsub.f32 %v2428_v26, %v682_v57 }
 0x2e2   : > { %v2671_v43 = vpop.f32.mrf.mxu1  ;;  %v673_v39 = vpop.xlane.xlu0 %672  ;;  %1900 = vpow2.f32 %v853_v29  ;;  %v845_v29 = vmul.f32 1.442695, %v765_v36 }
 0x2e3   : > { %3110 = vst [vmem:[#allocation61_spill] sm:$0xff] %v2671_v43  ;;  %v1353_v37 = vmax.f32 %v2667_v41, %v2671_v43  ;;  %1902 = vpow2.f32 %v847_v22  ;;  %v762_v33 = vsub.f32 %v2416_v20, %v673_v39  ;;  %v1350_v20 = vmax.f32 %v2663_v7, %v2665_v35 }
 0x2e4   : > { %v2677_v61 = vpop.f32.mrf.mxu1  ;;  %1904 = vpow2.f32 %v857_v38  ;;  %v849_v57 = vmul.f32 1.442695, %v767_v1 }
 0x2e5   : > { %1354 = vmax.xlane.f32.xlu0 %v1353_v37  ;;  %v1885_v46 = vpop.eup %1884  ;;  %v676_v37 = vpop.xlane.xlu1 %675  ;;  %1906 = vpow2.f32 %v851_v27 }
 0x2e6   : > { %v2679_v25 = vpop.f32.mrf.mxu1  ;;  %v1887_v47 = vpop.eup %1886  ;;  %v957_v31 = vpack.c.bf16 %v1885_v46, %v1881_v44  ;;  %v764_v12 = vsub.f32 %v2420_v23, %v676_v37  ;;  %1908 = vpow2.f32 %v845_v29  ;;  %v1335_v29 = vmax.f32 %v2633_v32, %v2635_v17 }
 0x2e7   : > { %v1889_v43 = vpop.eup %1888  ;;  %v958_v41 = vpack.c.bf16 %v1887_v47, %v1883_v40  ;;  %v1356_v30 = vmax.f32 %v2677_v61, %v2679_v25  ;;  %v667_v22 = vpop.xlane.xlu0 %666 }
 0x2e8   : > { %v2683_v28 = vpop.f32.mrf.mxu1  ;;  %v1891_v3 = vpop.eup %1890  ;;  %v843_v38 = vmul.f32 1.442695, %v764_v12 }
 0x2e9   : > { %1348 = vmax.xlane.f32.xlu0 %v1347_v54  ;;  %975 = vmatprep.subr.bf16.mxu0 %v958_v41  ;;  %v956_v46 = vpack.c.bf16 %v1891_v3, %v1889_v43  ;;  %v1893_v3 = vpop.eup %1892  ;;  %v839_v41 = vmul.f32 1.442695, %v762_v33  ;;  %v761_v54 = vsub.f32 %v2412_v19, %v673_v39  ;;  %v670_v27 = vpop.xlane.xlu1 %669  ;;  %v758_v33 = vsub.f32 %v2406_v15, %v667_v22 }
 0x2ea   : > { %v2689_v44 = vpop.f32.mrf.mxu1  ;;  %976 = vmatpush1.bf16.xpose.msra.mxu0 %v957_v31  ;;  %1357 = vmax.xlane.f32.xlu1 %v1356_v30  ;;  %v1344_v30 = vmax.f32 %v2650_v45, %v2652_v42  ;;  %v760_v12 = vsub.f32 %v2410_v18, %v670_v27 }
 0x2eb   : > { %977 = vmatprep.subr.bf16.mxu0 %v956_v46  ;;  %1910 = vpow2.f32 %v839_v41  ;;  %v837_v39 = vmul.f32 1.442695, %v761_v54  ;;  %v831_v15 = vmul.f32 1.442695, %v758_v33 }
 0x2ec   : > { %v2695_v40 = vpop.f32.mrf.mxu1  ;;  %v1895_v26 = vpop.eup %1894  ;;  %1912 = vpow2.f32 %v849_v57 }
 0x2ed   : > { %1342 = vmax.xlane.f32.xlu0 %v1341_v24  ;;  %v1897_v47 = vpop.eup %1896  ;;  %v763_v24 = vsub.f32 %v2418_v21, %v676_v37  ;;  %1914 = vpow2.f32 %v843_v38  ;;  %v661_v57 = vpop.xlane.xlu0 %660  ;;  %v835_v37 = vmul.f32 1.442695, %v760_v12  ;;  %v757_v38 = vsub.f32 %v2402_v14, %v667_v22 }
 0x2ee   : > { %v2699_v43 = vpop.f32.mrf.mxu1  ;;  %1351 = vmax.xlane.f32.xlu1 %v1350_v20  ;;  %v1899_v23 = vpop.eup %1898  ;;  %v955_v36 = vpack.c.bf16 %v1893_v3, %v1897_v47  ;;  %1916 = vpow2.f32 %v837_v39  ;;  %v1329_v39 = vmax.f32 %v2625_v50, %v2627_v55  ;;  %v3126_v55 = vld [vmem:[#allocation37_spill] sm:$0xff] }
 0x2ef   : > { %v954_v46 = vpack.c.bf16 %v1899_v23, %v1895_v26  ;;  %v1901_v20 = vpop.eup %1900  ;;  %v841_v26 = vmul.f32 1.442695, %v763_v24  ;;  %v664_v23 = vpop.xlane.xlu1 %663  ;;  %1918 = vpow2.f32 %v831_v15  ;;  %v759_v24 = vsub.f32 %v2408_v16, %v670_v27 }
 0x2f0   : > { %v2701_v31 = vpop.f32.mrf.mxu1  ;;  %v1903_v41 = vpop.eup %1902  ;;  %v756_v12 = vsub.f32 %v2400_v13, %v664_v23  ;;  %v829_v22 = vmul.f32 1.442695, %v757_v38 }
 0x2f1   : > { %v1905_v21 = vpop.eup %1904  ;;  %1920 = vpow2.f32 %v841_v26  ;;  %v655_v26 = vpop.xlane.xlu0 %654 }
 0x2f2   : > { %v2707_v1 = vpop.f32.mrf.mxu1  ;;  %978 = vmatpush1.bf16.xpose.msra.mxu0 %v955_v36  ;;  %1345 = vmax.xlane.f32.xlu1 %v1344_v30  ;;  %v1907_v18 = vpop.eup %1906  ;;  %v953_v54 = vpack.c.bf16 %v1905_v21, %v1901_v20  ;;  %v1338_v36 = vmax.f32 %v2637_v2, %v2639_v52  ;;  %v754_v30 = vsub.f32 %v2396_v10, %v661_v57  ;;  %1922 = vpow2.f32 %v835_v37 }
 0x2f3   : > { %979 = vmatprep.subr.bf16.mxu0 %v954_v46  ;;  %v952_v33 = vpack.c.bf16 %v1907_v18, %v1903_v41  ;;  %v833_v41 = vmul.f32 1.442695, %v759_v24  ;;  %v827_v27 = vmul.f32 1.442695, %v756_v12  ;;  %1924 = vpow2.f32 %v829_v22  ;;  %v658_v18 = vpop.xlane.xlu1 %657 }
 0x2f4   : > { %v2711_v19 = vpop.f32.mrf.mxu1  ;;  %v823_v10 = vmul.f32 1.442695, %v754_v30  ;;  %v753_v37 = vsub.f32 %v2392_v9, %v661_v57  ;;  %v3111_v30 = vld [vmem:[#allocation10_spill] sm:$0xff]  ;;  %v3113_v9 = vld [vmem:[#allocation12_spill] sm:$0xff] }
 0x2f5   : > { %v752_v57 = vsub.f32 %v3113_v9, %v658_v18 }
 0x2f6   : > { %v2715_v3 = vpop.f32.mrf.mxu1  ;;  %1336 = vmax.xlane.f32.xlu1 %v1335_v29  ;;  %v1909_v29 = vpop.eup %1908  ;;  %1926 = vpow2.f32 %v823_v10  ;;  %v1323_v10 = vmax.f32 %v2617_v6, %v2619_v49  ;;  %v3115_v6 = vld [vmem:[#allocation11_spill] sm:$0xff] }
 0x2f7   : > { %1928 = vpow2.f32 %v833_v41 }
 0x2f8   : > { %v2717_v47 = vpop.f32.mrf.mxu1  ;;  %v1911_v15 = vpop.eup %1910  ;;  %1930 = vpow2.f32 %v827_v27 }
 0x2f9   : > { %v1913_v16 = vpop.eup %1912 }
 0x2fa   : > { %v2723_v46 = vpop.f32.mrf.mxu1  ;;  %980 = vmatpush1.bf16.xpose.msra.mxu0 %v953_v54  ;;  %1339 = vmax.xlane.f32.xlu1 %v1338_v36  ;;  %v1915_v13 = vpop.eup %1914  ;;  %v951_v38 = vpack.c.bf16 %v1913_v16, %v1909_v29  ;;  %v1332_v54 = vmax.f32 %v2629_v59, %v2631_v0  ;;  %v208_v36 = vld [vmem:[%s2990_s2 + $0x10] sm:$0xff]  ;;  %v821_v16 = vmul.f32 1.442695, %v753_v37  ;;  %v1326_v37 = vmax.f32 %v2621_v4, %v2623_v53 }
 0x2fb   : > { %981 = vmatprep.subr.bf16.mxu0 %v952_v33  ;;  %v750_v33 = vsub.f32 %v3111_v30, %v655_v26  ;;  %v950_v24 = vpack.c.bf16 %v1915_v13, %v1911_v15  ;;  %v1917_v30 = vpop.eup %1916 }
 0x2fc   : > { %v2727_v14 = vpop.f32.mrf.mxu1  ;;  %v1919_v41 = vpop.eup %1918  ;;  %1932 = vpow2.f32 %v821_v16 }
 0x2fd   : > { %v815_v15 = vmul.f32 1.442695, %v750_v33 }
 0x2fe   : > { %v2731_v20 = vpop.f32.mrf.mxu1  ;;  %1330 = vmax.xlane.f32.xlu1 %v1329_v39  ;;  %v3112_v39 = vld [vmem:[#allocation13_spill] sm:$0xff] }
 0x2ff   : > { %v755_v22 = vsub.f32 %v3112_v39, %v664_v23  ;;  %v1921_v23 = vpop.eup %1920  ;;  %1934 = vpow2.f32 %v815_v15 }
 0x300   : > { %v2733_v21 = vpop.f32.mrf.mxu1  ;;  %v949_v39 = vpack.c.bf16 %v1921_v23, %v1917_v30 }
 0x301   : > { %v825_v50 = vmul.f32 1.442695, %v755_v22  ;;  %v751_v22 = vsub.f32 %v3115_v6, %v658_v18 }
 0x302   : > { %v2742_v12 = vpop.f32.mrf.mxu1  ;;  %982 = vmatpush1.bf16.xpose.msra.mxu0 %v951_v38  ;;  %1333 = vmax.xlane.f32.xlu1 %v1332_v54  ;;  %v819_v38 = vmul.f32 1.442695, %v752_v57  ;;  %v1923_v54 = vpop.eup %1922 }
 0x303   : > { %983 = vmatprep.subr.bf16.mxu0 %v950_v24  ;;  %224 = vperm.xlu0 %1877, %v208_v36   ;;  %v3114_v36 = vld [vmem:[#allocation9_spill] sm:$0xff]  ;;  %v948_v9 = vpack.c.bf16 %v1923_v54, %v1919_v41  ;;  %1936 = vpow2.f32 %v825_v50  ;;  %v817_v41 = vmul.f32 1.442695, %v751_v22 }
 0x304   : > { %v2746_v29 = vpop.f32.mrf.mxu1  ;;  %v749_v24 = vsub.f32 %v3114_v36, %v655_v26  ;;  %1938 = vpow2.f32 %v819_v38  ;;  %v1320_v26 = vmax.f32 %v2613_v62, %v2615_v8  ;;  %v1311_v36 = vmax.f32 %v2601_v56, %v2603_v11  ;;  %v3116_v8 = vld [vmem:[#allocation42_spill] sm:$0xff] }
 0x306   : > { %v2750_v13 = vpop.f32.mrf.mxu1  ;;  %1324 = vmax.xlane.f32.xlu1 %v1323_v10  ;;  %v813_v16 = vmul.f32 1.442695, %v749_v24  ;;  %v1925_v10 = vpop.eup %1924 }
 0x307   : > { %v1927_v15 = vpop.eup %1926 }
 0x308   : > { %v2752_v27 = vpop.f32.mrf.mxu1  ;;  %v1929_v50 = vpop.eup %1928  ;;  %1940 = vpow2.f32 %v813_v16 }
 0x309   : > { %v1931_v38 = vpop.eup %1930  ;;  %v947_v54 = vpack.c.bf16 %v1929_v50, %v1925_v10  ;;  %1942 = vpow2.f32 %v817_v41  ;;  %v3118_v50 = vld [vmem:[#allocation39_spill] sm:$0xff] }
 0x30a   : > { %v2757_v33 = vpop.f32.mrf.mxu1  ;;  %984 = vmatpush1.bf16.xpose.msra.mxu0 %v949_v39  ;;  %1327 = vmax.xlane.f32.xlu1 %v1326_v37  ;;  %v946_v24 = vpack.c.bf16 %v1931_v38, %v1927_v15  ;;  %v3119_v15 = vld [vmem:[#allocation46_spill] sm:$0xff]  ;;  %v3120_v38 = vld [vmem:[#allocation45_spill] sm:$0xff]  ;;  %v1933_v62 = vpop.eup %1932 }
 0x30b   : > { %985 = vmatprep.subr.bf16.mxu0 %v948_v9  ;;  %v1314_v11 = vmax.f32 %v3120_v38, %v3119_v15  ;;  %v3123_v38 = vld [vmem:[#allocation40_spill] sm:$0xff] }
 0x30c   : > { %v2760_v57 = vpop.f32.mrf.mxu1 }
 0x30e   : > { %v745_v30 = vpop.xlane.xlu0 %744  ;;  %v2764_v23 = vpop.f32.mrf.mxu1  ;;  %1321 = vmax.xlane.f32.xlu1 %v1320_v26 }
 0x30f   : > { %v810_v6 = vsub.f32 %v2559_v5, %v745_v30  ;;  %v809_v9 = vsub.f32 %v2557_v51, %v745_v30  ;;  %v1935_v30 = vpop.eup %1934 }
 0x310   : > { %v2767_v18 = vpop.f32.mrf.mxu1 }
 0x311   : > { %v935_v26 = vmul.f32 1.442695, %v810_v6 }
 0x312   : > { %v739_v39 = vpop.xlane.xlu0 %738  ;;  %v2771_v37 = vpop.f32.mrf.mxu1  ;;  %986 = vmatpush1.bf16.xpose.msra.mxu0 %v947_v54  ;;  %1312 = vmax.xlane.f32.xlu1 %v1311_v36  ;;  %v933_v54 = vmul.f32 1.442695, %v809_v9 }
 0x313   : > { %v748_v22 = vpop.xlane.xlu1 %747  ;;  %987 = vmatprep.subr.bf16.mxu0 %v946_v24  ;;  %v806_v56 = vsub.f32 %v3118_v50, %v739_v39  ;;  %v1937_v36 = vpop.eup %1936  ;;  %1944 = vpow2.f32 %v935_v26 }
 0x314   : > { %v811_v5 = vsub.f32 %v2563_v34, %v748_v22  ;;  %v812_v16 = vsub.f32 %v3116_v8, %v748_v22  ;;  %v2776_v10 = vpop.f32.mrf.mxu1  ;;  %v3122_v34 = vld [vmem:[#allocation41_spill] sm:$0xff]  ;;  %v1939_v22 = vpop.eup %1938 }
 0x315   : > { %3117 = vst [vmem:[#allocation10_spill] sm:$0xff] %v2776_v10  ;;  %v927_v50 = vmul.f32 1.442695, %v806_v56  ;;  %v944_v49 = vpack.c.bf16 %v1939_v22, %v1935_v30 }
 0x316   : > { %v937_v41 = vmul.f32 1.442695, %v811_v5  ;;  %v939_v4 = vmul.f32 1.442695, %v812_v16  ;;  %v2781_v51 = vpop.f32.mrf.mxu1  ;;  %1315 = vmax.xlane.f32.xlu1 %v1314_v11  ;;  %v733_v53 = vpop.xlane.xlu0 %732  ;;  %v945_v5 = vpack.c.bf16 %v1937_v36, %v1933_v62  ;;  %v3124_v11 = vld [vmem:[#allocation38_spill] sm:$0xff] }
 0x317   : > { %3121 = vst [vmem:[#allocation13_spill] sm:$0xff] %v2781_v51  ;;  %v742_v6 = vpop.xlane.xlu1 %741  ;;  %v805_v9 = vsub.f32 %v3124_v11, %v739_v39  ;;  %v1941_v62 = vpop.eup %1940  ;;  %v3129_v11 = vld [vmem:[#allocation48_spill] sm:$0xff] }
 0x318   : > { %v808_v8 = vsub.f32 %v3122_v34, %v742_v6  ;;  %v2784_v24 = vpop.f32.mrf.mxu1  ;;  %1946 = vpow2.f32 %v937_v41  ;;  %v807_v15 = vsub.f32 %v3123_v38, %v742_v6  ;;  %v3125_v34 = vld [vmem:[#allocation35_spill] sm:$0xff]  ;;  %v1943_v36 = vpop.eup %1942 }
 0x319   : > { %1948 = vpow2.f32 %v939_v4  ;;  %v802_v0 = vsub.f32 %v3125_v34, %v733_v53  ;;  %v925_v6 = vmul.f32 1.442695, %v805_v9  ;;  %v3130_v34 = vld [vmem:[#allocation47_spill] sm:$0xff]  ;;  %v3133_v9 = vld [vmem:[#allocation34_spill] sm:$0xff] }
 0x31a   : > { %v931_v16 = vmul.f32 1.442695, %v808_v8  ;;  %v2787_v59 = vpop.f32.mrf.mxu1  ;;  %1950 = vpow2.f32 %v933_v54  ;;  %988 = vmatpush1.bf16.xpose.msra.mxu0 %v945_v5  ;;  %v929_v38 = vmul.f32 1.442695, %v807_v15  ;;  %v727_v22 = vpop.xlane.xlu0 %726  ;;  %v3131_v15 = vld [vmem:[#allocation33_spill] sm:$0xff]  ;;  %v801_v32 = vsub.f32 %v3133_v9, %v733_v53 }
 0x31b   : > { %v736_v26 = vpop.xlane.xlu1 %735  ;;  %989 = vmatprep.subr.bf16.mxu0 %v944_v49  ;;  %1952 = vpow2.f32 %v927_v50  ;;  %v919_v39 = vmul.f32 1.442695, %v802_v0  ;;  %v3128_v49 = vld [vmem:[#allocation36_spill] sm:$0xff]  ;;  %v1317_v50 = vmax.f32 %v3130_v34, %v3129_v11 }
 0x31c   : > { %v804_v56 = vsub.f32 %v3126_v55, %v736_v26  ;;  %v2792_v41 = vpop.f32.mrf.mxu1  ;;  %1954 = vpow2.f32 %v931_v16  ;;  %v803_v5 = vsub.f32 %v3128_v49, %v736_v26  ;;  %v943_v55 = vpack.c.bf16 %v1943_v36, %v1941_v62 }
 0x31d   : > { %1956 = vpow2.f32 %v929_v38  ;;  %v3134_v38 = vld [vmem:[#allocation31_spill] sm:$0xff] }
 0x31e   : > { %v923_v4 = vmul.f32 1.442695, %v804_v56  ;;  %v2794_v30 = vpop.f32.mrf.mxu1  ;;  %v798_v26 = vsub.f32 %v3134_v38, %v727_v22  ;;  %v921_v49 = vmul.f32 1.442695, %v803_v5  ;;  %v721_v5 = vpop.xlane.xlu0 %720 }
 0x31f   : > { %v730_v54 = vpop.xlane.xlu1 %729 }
 0x320   : > { %v2796_v8 = vpop.f32.mrf.mxu1  ;;  %1958 = vpow2.f32 %v923_v4  ;;  %v800_v16 = vsub.f32 %v3131_v15, %v730_v54  ;;  %v1945_v36 = vpop.eup %1944  ;;  %v1392_v4 = vmax.f32 %v2776_v10, %v2781_v51  ;;  %v911_v38 = vmul.f32 1.442695, %v798_v26 }
 0x321   : > { %3127 = vst [vmem:[#allocation12_spill] sm:$0xff] %v2796_v8  ;;  %1960 = vpow2.f32 %v925_v6  ;;  %v1395_v26 = vmax.f32 %v2784_v24, %v2787_v59 }
 0x322   : > { %v2802_v56 = vpop.f32.mrf.mxu1  ;;  %990 = vmatpush1.bf16.xpose.msra.mxu0 %v943_v55  ;;  %1318 = vmax.xlane.f32.xlu0 %v1317_v50  ;;  %1962 = vpow2.f32 %v919_v39  ;;  %v915_v6 = vmul.f32 1.442695, %v800_v16  ;;  %v917_v55 = vmul.f32 1.442695, %v801_v32  ;;  %v1386_v16 = vmax.f32 %v2760_v57, %v2764_v23  ;;  %v3138_v32 = vld [vmem:[#allocation29_spill] sm:$0xff] }
 0x323   : > { %3132 = vst [vmem:[#allocation9_spill] sm:$0xff] %v2802_v56  ;;  %v1401_v0 = vmax.f32 %v2796_v8, %v2802_v56  ;;  %v724_v50 = vpop.xlane.xlu1 %723  ;;  %1964 = vpow2.f32 %v921_v49 }
 0x324   : > { %v2808_v62 = vpop.f32.mrf.mxu1  ;;  %1966 = vpow2.f32 %v915_v6  ;;  %v796_v51 = vsub.f32 %v3138_v32, %v724_v50  ;;  %v1380_v6 = vmax.f32 %v2746_v29, %v2750_v13  ;;  %v3142_v32 = vld [vmem:[#allocation25_spill] sm:$0xff] }
 0x325   : > { %3135 = vst [vmem:[#allocation11_spill] sm:$0xff] %v2808_v62  ;;  %1402 = vmax.xlane.f32.xlu1 %v1401_v0  ;;  %v1947_v15 = vpop.eup %1946  ;;  %v3137_v0 = vld [vmem:[#allocation32_spill] sm:$0xff]  ;;  %1968 = vpow2.f32 %v917_v55 }
 0x326   : > { %v2812_v11 = vpop.f32.mrf.mxu1  ;;  %v1949_v53 = vpop.eup %1948  ;;  %1393 = vmax.xlane.f32.xlu0 %v1392_v4  ;;  %v799_v56 = vsub.f32 %v3137_v0, %v730_v54  ;;  %1970 = vpow2.f32 %v911_v38  ;;  %v3140_v54 = vld [vmem:[#allocation27_spill] sm:$0xff] }
 0x327   : > { %3136 = vst [vmem:[#allocation42_spill] sm:$0xff] %v2812_v11  ;;  %v1404_v39 = vmax.f32 %v2808_v62, %v2812_v11  ;;  %v1951_v9 = vpop.eup %1950  ;;  %v974_v8 = vpack.c.bf16 %v1949_v53, %v1945_v36  ;;  %v3139_v62 = vld [vmem:[#allocation30_spill] sm:$0xff]  ;;  %v794_v36 = vsub.f32 %v3140_v54, %v721_v5 }
 0x328   : > { %v973_v34 = vpack.c.bf16 %v1947_v15, %v1951_v9  ;;  %v1953_v10 = vpop.eup %1952  ;;  %v797_v11 = vsub.f32 %v3139_v62, %v727_v22  ;;  %v913_v15 = vmul.f32 1.442695, %v799_v56  ;;  %v718_v22 = vpop.xlane.xlu1 %717  ;;  %v3141_v56 = vld [vmem:[#allocation28_spill] sm:$0xff]  ;;  %v3143_v54 = vld [vmem:[#allocation26_spill] sm:$0xff] }
 0x329   : > { %1405 = vmax.xlane.f32.xlu1 %v1404_v39  ;;  %991 = vmatprep.subr.bf16.mxu0 %v974_v8  ;;  %v1955_v4 = vpop.eup %1954  ;;  %v907_v8 = vmul.f32 1.442695, %v796_v51  ;;  %v903_v9 = vmul.f32 1.442695, %v794_v36  ;;  %v795_v0 = vsub.f32 %v3141_v56, %v724_v50  ;;  %v1374_v51 = vmax.f32 %v2727_v14, %v2731_v20 }
 0x32a   : > { %992 = vmatpush2.bf16.xpose.msra.mxu0 %v973_v34  ;;  %1387 = vmax.xlane.f32.xlu0 %v1386_v16  ;;  %v972_v49 = vpack.c.bf16 %v1955_v4, %v1953_v10  ;;  %v1957_v53 = vpop.eup %1956  ;;  %v909_v39 = vmul.f32 1.442695, %v797_v11  ;;  %v1398_v34 = vmax.f32 %v2792_v41, %v2794_v30  ;;  %1972 = vpow2.f32 %v913_v15  ;;  %v715_v10 = vpop.xlane.xlu0 %714 }
 0x32b   : > { %1974 = vpow2.f32 %v907_v8  ;;  %v792_v11 = vsub.f32 %v3142_v32, %v718_v22  ;;  %v793_v36 = vsub.f32 %v3143_v54, %v721_v5  ;;  %v905_v15 = vmul.f32 1.442695, %v795_v0 }
 0x32c   : > { %993 = vmatprep.subr.bf16.mxu0 %v972_v49  ;;  %1976 = vpow2.f32 %v909_v39  ;;  %v3144_v49 = vld [vmem:[#allocation23_spill] sm:$0xff]  ;;  %v1362_v32 = vmax.f32 %v2695_v40, %v2699_v43  ;;  %v1377_v54 = vmax.f32 %v2733_v21, %v2742_v12 }
 0x32d   : > { %1396 = vmax.xlane.f32.xlu1 %v1395_v26  ;;  %v1959_v55 = vpop.eup %1958  ;;  %v1389_v26 = vmax.f32 %v2767_v18, %v2771_v37  ;;  %1978 = vpow2.f32 %v903_v9  ;;  %v790_v50 = vsub.f32 %v3144_v49, %v715_v10  ;;  %v899_v8 = vmul.f32 1.442695, %v792_v11  ;;  %v3146_v11 = vld [vmem:[#allocation21_spill] sm:$0xff] }
 0x32e   : > { %1381 = vmax.xlane.f32.xlu0 %v1380_v6  ;;  %v1961_v62 = vpop.eup %1960  ;;  %v1368_v6 = vmax.f32 %v2711_v19, %v2715_v3  ;;  %v901_v39 = vmul.f32 1.442695, %v793_v36  ;;  %1980 = vpow2.f32 %v905_v15  ;;  %v709_v56 = vpop.xlane.xlu0 %708  ;;  %v3147_v36 = vld [vmem:[#allocation22_spill] sm:$0xff] }
 0x32f   : > { %v1963_v38 = vpop.eup %1962  ;;  %v971_v16 = vpack.c.bf16 %v1957_v53, %v1961_v62  ;;  %v712_v62 = vpop.xlane.xlu1 %711  ;;  %1982 = vpow2.f32 %v899_v8  ;;  %v789_v49 = vsub.f32 %v3147_v36, %v715_v10 }
 0x330   : > { %v970_v4 = vpack.c.bf16 %v1959_v55, %v1963_v38  ;;  %v1965_v53 = vpop.eup %1964  ;;  %v895_v38 = vmul.f32 1.442695, %v790_v50  ;;  %1984 = vpow2.f32 %v901_v39  ;;  %v3148_v50 = vld [vmem:[#allocation19_spill] sm:$0xff] }
 0x331   : > { %1399 = vmax.xlane.f32.xlu1 %v1398_v34  ;;  %v1967_v55 = vpop.eup %1966  ;;  %v1383_v34 = vmax.f32 %v2752_v27, %v2757_v33 }
 0x332   : > { %994 = vmatpush2.bf16.xpose.msra.mxu0 %v971_v16  ;;  %1375 = vmax.xlane.f32.xlu0 %v1374_v51  ;;  %v1969_v5 = vpop.eup %1968  ;;  %v3145_v16 = vld [vmem:[#allocation24_spill] sm:$0xff]  ;;  %1986 = vpow2.f32 %v895_v38  ;;  %v703_v10 = vpop.xlane.xlu0 %702 }
 0x333   : > { %995 = vmatprep.subr.bf16.mxu0 %v970_v4  ;;  %v1971_v9 = vpop.eup %1970  ;;  %v791_v0 = vsub.f32 %v3145_v16, %v718_v22  ;;  %v969_v51 = vpack.c.bf16 %v1965_v53, %v1969_v5  ;;  %v788_v4 = vsub.f32 %v3146_v11, %v712_v62  ;;  %v786_v22 = vsub.f32 %v3148_v50, %v709_v56  ;;  %v706_v5 = vpop.xlane.xlu1 %705 }
 0x335   : > { %1390 = vmax.xlane.f32.xlu1 %v1389_v26  ;;  %v968_v26 = vpack.c.bf16 %v1967_v55, %v1971_v9  ;;  %v897_v15 = vmul.f32 1.442695, %v791_v0  ;;  %v891_v53 = vmul.f32 1.442695, %v788_v4  ;;  %v1371_v55 = vmax.f32 %v2717_v47, %v2723_v46  ;;  %v3150_v0 = vld [vmem:[#allocation17_spill] sm:$0xff] }
 0x336   : > { %1369 = vmax.xlane.f32.xlu0 %v1368_v6  ;;  %v887_v39 = vmul.f32 1.442695, %v786_v22  ;;  %v784_v11 = vsub.f32 %v3150_v0, %v706_v5  ;;  %v1365_v4 = vmax.f32 %v2701_v31, %v2707_v1 }
 0x337   : > { %v1973_v6 = vpop.eup %1972  ;;  %1988 = vpow2.f32 %v897_v15 }
 0x338   : > { %v1975_v8 = vpop.eup %1974  ;;  %1990 = vpow2.f32 %v891_v53  ;;  %v883_v15 = vmul.f32 1.442695, %v784_v11  ;;  %v1359_v53 = vmax.f32 %v2683_v28, %v2689_v44 }
 0x339   : > { %1384 = vmax.xlane.f32.xlu1 %v1383_v34  ;;  %v893_v34 = vmul.f32 1.442695, %v789_v49  ;;  %v1977_v9 = vpop.eup %1976  ;;  %v3152_v49 = vld [vmem:[#allocation15_spill] sm:$0xff] }
 0x33a   : > { %996 = vmatpush2.bf16.xpose.msra.mxu0 %v969_v51  ;;  %1363 = vmax.xlane.f32.xlu0 %v1362_v32  ;;  %v1979_v16 = vpop.eup %1978  ;;  %v3149_v51 = vld [vmem:[#allocation20_spill] sm:$0xff]  ;;  %v967_v32 = vpack.c.bf16 %v1973_v6, %v1977_v9  ;;  %v782_v50 = vsub.f32 %v3152_v49, %v703_v10 }
 0x33b   : > { %997 = vmatprep.subr.bf16.mxu0 %v968_v26  ;;  %v787_v38 = vsub.f32 %v3149_v51, %v712_v62  ;;  %v966_v26 = vpack.c.bf16 %v1975_v8, %v1979_v16  ;;  %1992 = vpow2.f32 %v893_v34  ;;  %v1981_v62 = vpop.eup %1980  ;;  %v3153_v34 = vld [vmem:[#allocation16_spill] sm:$0xff] }
 0x33c   : > { %1994 = vpow2.f32 %v887_v39  ;;  %v1983_v6 = vpop.eup %1982  ;;  %v879_v9 = vmul.f32 1.442695, %v782_v50 }
 0x33d   : > { %1378 = vmax.xlane.f32.xlu1 %v1377_v54  ;;  %v3151_v54 = vld [vmem:[#allocation18_spill] sm:$0xff]  ;;  %v889_v22 = vmul.f32 1.442695, %v787_v38 }
 0x33e   : > { %v785_v36 = vsub.f32 %v3151_v54, %v709_v56  ;;  %v783_v56 = vsub.f32 %v3153_v34, %v706_v5  ;;  %v3154_v38 = vld [vmem:[#allocation14_spill] sm:$0xff]  ;;  %v3155_v34 = vld [vmem:[#allocation60_spill] sm:$0xff] }
 0x33f   : > { %1996 = vpow2.f32 %v889_v22 }
 0x340   : > { %v885_v8 = vmul.f32 1.442695, %v785_v36  ;;  %1998 = vpow2.f32 %v883_v15  ;;  %v881_v0 = vmul.f32 1.442695, %v783_v56 }
 0x341   : > { %1372 = vmax.xlane.f32.xlu1 %v1371_v55  ;;  %v1985_v55 = vpop.eup %1984 }
 0x342   : > { %998 = vmatpush2.bf16.xpose.msra.mxu0 %v967_v32  ;;  %v1987_v16 = vpop.eup %1986  ;;  %v965_v51 = vpack.c.bf16 %v1981_v62, %v1985_v55  ;;  %2000 = vpow2.f32 %v885_v8  ;;  %v781_v32 = vsub.f32 %v3154_v38, %v703_v10  ;;  %v211_v10 = vld [vmem:[%s2990_s2 + $0x28] sm:$0xff] }
 0x343   : > { %999 = vmatprep.subr.bf16.mxu0 %v966_v26  ;;  %v964_v39 = vpack.c.bf16 %v1983_v6, %v1987_v16  ;;  %2002 = vpow2.f32 %v879_v9 }
 0x344   : > { %v1989_v11 = vpop.eup %1988  ;;  %2004 = vpow2.f32 %v881_v0 }
 0x345   : > { %1366 = vmax.xlane.f32.xlu1 %v1365_v4  ;;  %v1991_v26 = vpop.eup %1990  ;;  %v877_v4 = vmul.f32 1.442695, %v781_v32 }
 0x347   : > { %2006 = vpow2.f32 %v877_v4 }
 0x348   : > { %v1993_v54 = vpop.eup %1992 }
 0x349   : > { %1360 = vmax.xlane.f32.xlu1 %v1359_v53  ;;  %v1995_v36 = vpop.eup %1994  ;;  %v963_v49 = vpack.c.bf16 %v1989_v11, %v1993_v54 }
 0x34a   : > { %1000 = vmatpush2.bf16.xpose.msra.mxu0 %v965_v51  ;;  %v962_v50 = vpack.c.bf16 %v1991_v26, %v1995_v36  ;;  %v3156_v51 = vld [vmem:[#allocation61_spill] sm:$0xff] }
 0x34b   : > { %1001 = vmatprep.subr.bf16.mxu0 %v964_v39 }
 0x34c   : > { %v1997_v5 = vpop.eup %1996 }
 0x34d   : > { %v1999_v22 = vpop.eup %1998 }
 0x34f   : > { %v2001_v62 = vpop.eup %2000 }
 0x350   : > { %v2003_v15 = vpop.eup %2002  ;;  %v961_v6 = vpack.c.bf16 %v1997_v5, %v2001_v62 }
 0x351   : > { %v960_v53 = vpack.c.bf16 %v1999_v22, %v2003_v15  ;;  %v2005_v8 = vpop.eup %2004 }
 0x352   : > { %1002 = vmatpush2.bf16.xpose.msra.mxu0 %v963_v49 }
 0x353   : > { %1003 = vmatprep.subr.bf16.mxu0 %v962_v50 }
 0x354   : > { %v2007_v55 = vpop.eup %2006 }
 0x355   : > { %v959_v9 = vpack.c.bf16 %v2005_v8, %v2007_v55 }
 0x35a   : > { %239 = vperm.xlu1 %1878, %v211_v10   ;;  %1004 = vmatpush2.bf16.xpose.msra.mxu0 %v961_v6 }
 0x35b   : > { %1005 = vmatprep.subr.bf16.mxu0 %v960_v53 }
 0x362   : > { %1006 = vmatpush2.bf16.xpose.msra.mxu0 %v959_v9 }
 0x36e   : > { %v1355_v16 = vpop.xlane.xlu0 %1354 }
 0x36f   : > { %v1435_v56 = vsub.f32 %v3155_v34, %v1355_v16  ;;  %v1436_v39 = vsub.f32 %v3156_v51, %v1355_v16  ;;  %v3157_v34 = vld [vmem:[#allocation7_spill] sm:$0xff] }
 0x371   : > { %v1527_v32 = vmul.f32 1.442695, %v1435_v56  ;;  %v1529_v0 = vmul.f32 1.442695, %v1436_v39  ;;  %v3158_v56 = vld [vmem:[#allocation8_spill] sm:$0xff] }
 0x372   : > { %v1349_v38 = vpop.xlane.xlu0 %1348 }
 0x373   : > { %v1358_v11 = vpop.xlane.xlu1 %1357  ;;  %v1432_v26 = vsub.f32 %v2658_v58, %v1349_v38  ;;  %2008 = vpow2.f32 %v1527_v32  ;;  %v1431_v15 = vsub.f32 %v2655_v48, %v1349_v38 }
 0x374   : > { %v1437_v4 = vsub.f32 %v2677_v61, %v1358_v11  ;;  %v1438_v54 = vsub.f32 %v2679_v25, %v1358_v11  ;;  %2010 = vpow2.f32 %v1529_v0 }
 0x375   : > { %v1521_v5 = vmul.f32 1.442695, %v1432_v26  ;;  %v1519_v8 = vmul.f32 1.442695, %v1431_v15  ;;  %v3159_v15 = vld [vmem:[#allocation59_spill] sm:$0xff] }
 0x376   : > { %v1531_v36 = vmul.f32 1.442695, %v1437_v4  ;;  %v1533_v49 = vmul.f32 1.442695, %v1438_v54  ;;  %v1343_v22 = vpop.xlane.xlu0 %1342 }
 0x377   : > { %v1352_v50 = vpop.xlane.xlu1 %1351  ;;  %v1428_v61 = vsub.f32 %v2645_v63, %v1343_v22  ;;  %v1427_v38 = vsub.f32 %v2643_v60, %v1343_v22 }
 0x378   : > { %2012 = vpow2.f32 %v1531_v36  ;;  %v1433_v10 = vsub.f32 %v2663_v7, %v1352_v50  ;;  %v1434_v62 = vsub.f32 %v2665_v35, %v1352_v50 }
 0x379   : > { %2014 = vpow2.f32 %v1533_v49  ;;  %v1513_v16 = vmul.f32 1.442695, %v1428_v61 }
 0x37a   : > { %v1525_v58 = vmul.f32 1.442695, %v1434_v62  ;;  %2016 = vpow2.f32 %v1521_v5  ;;  %v1523_v25 = vmul.f32 1.442695, %v1433_v10 }
 0x37b   : > { %v1346_v6 = vpop.xlane.xlu1 %1345 }
 0x37c   : > { %v1430_v53 = vsub.f32 %v2652_v42, %v1346_v6  ;;  %2018 = vpow2.f32 %v1525_v58  ;;  %v1429_v48 = vsub.f32 %v2650_v45, %v1346_v6  ;;  %v1511_v45 = vmul.f32 1.442695, %v1427_v38 }
 0x37d   : > { %2020 = vpow2.f32 %v1523_v25 }
 0x37e   : > { %v1517_v55 = vmul.f32 1.442695, %v1430_v53  ;;  %v225_v9 = vpop.permute.xlu0 %224  ;;  %v1515_v26 = vmul.f32 1.442695, %v1429_v48 }
 0x37f   : > { %v347_v7 = vadd.f32 %v3157_v34, %v225_v9  ;;  %v349_v35 = vadd.f32 %v3158_v56, %v225_v9  ;;  %v1337_v51 = vpop.xlane.xlu1 %1336 }
 0x380   : > { %2022 = vpow2.f32 %v1517_v55  ;;  %v2009_v42 = vpop.eup %2008  ;;  %v1424_v32 = vsub.f32 %v2635_v17, %v1337_v51  ;;  %v1423_v58 = vsub.f32 %v3159_v15, %v1337_v51  ;;  %v3162_v51 = vld [vmem:[#allocation57_spill] sm:$0xff] }
 0x381   : > { %v941_v63 = vpack.c.bf16 %v347_v7, %v347_v7  ;;  %v942_v39 = vpack.c.bf16 %v349_v35, %v349_v35  ;;  %2024 = vpow2.f32 %v1519_v8  ;;  %v2011_v11 = vpop.eup %2010  ;;  %v3161_v8 = vld [vmem:[#allocation58_spill] sm:$0xff] }
 0x382   : > { %2026 = vpow2.f32 %v1513_v16  ;;  %v1505_v5 = vmul.f32 1.442695, %v1424_v32 }
 0x383   : > { %v1340_v0 = vpop.xlane.xlu1 %1339  ;;  %1007 = vmatprep.mubr.bf16.mxu0 %v942_v39  ;;  %2028 = vpow2.f32 %v1515_v26 }
 0x384   : > { %v1426_v4 = vsub.f32 %v2639_v52, %v1340_v0  ;;  %1008 = vmatmul.mubr.bf16.vlgmr.msra.gmra.mxu0 %v941_v63  ;;  %v1425_v60 = vsub.f32 %v2637_v2, %v1340_v0  ;;  %v3160_v52 = vld [vmem:[#allocation56_spill] sm:$0xff]  ;;  %v1503_v2 = vmul.f32 1.442695, %v1423_v58 }
 0x385   : > { %v2013_v54 = vpop.eup %2012  ;;  %v3164_v0 = vld [vmem:[#allocation52_spill] sm:$0xff] }
 0x386   : > { %v2015_v36 = vpop.eup %2014  ;;  %v1509_v49 = vmul.f32 1.442695, %v1426_v4  ;;  %v1615_v50 = vpack.c.bf16 %v2013_v54, %v2009_v42  ;;  %v1507_v53 = vmul.f32 1.442695, %v1425_v60  ;;  %v3163_v42 = vld [vmem:[#allocation55_spill] sm:$0xff]  ;;  %v3165_v54 = vld [vmem:[#allocation54_spill] sm:$0xff] }
 0x387   : > { %v1331_v10 = vpop.xlane.xlu1 %1330  ;;  %v1616_v62 = vpack.c.bf16 %v2015_v36, %v2011_v11  ;;  %v2017_v22 = vpop.eup %2016 }
 0x388   : > { %2030 = vpow2.f32 %v1509_v49  ;;  %v1420_v61 = vsub.f32 %v3160_v52, %v1331_v10  ;;  %v1419_v32 = vsub.f32 %v3163_v42, %v1331_v10 }
 0x389   : > { %1633 = vmatprep.subr.bf16.mxu0 %v1616_v62  ;;  %v2019_v17 = vpop.eup %2018  ;;  %2032 = vpow2.f32 %v1511_v45 }
 0x38a   : > { %1634 = vmatpush1.bf16.xpose.msra.mxu0 %v1615_v50  ;;  %2034 = vpow2.f32 %v1505_v5  ;;  %v1614_v25 = vpack.c.bf16 %v2019_v17, %v2017_v22  ;;  %v2021_v9 = vpop.eup %2020  ;;  %v1497_v56 = vmul.f32 1.442695, %v1420_v61  ;;  %v1495_v50 = vmul.f32 1.442695, %v1419_v32  ;;  %v3166_v17 = vld [vmem:[#allocation53_spill] sm:$0xff]  ;;  %v3167_v61 = vld [vmem:[#allocation51_spill] sm:$0xff] }
 0x38b   : > { %v1334_v6 = vpop.xlane.xlu1 %1333  ;;  %2036 = vpow2.f32 %v1507_v53  ;;  %v3170_v32 = vld [vmem:[#allocation46_spill] sm:$0xff] }
 0x38c   : > { %v1422_v55 = vsub.f32 %v3161_v8, %v1334_v6  ;;  %1635 = vmatprep.subr.bf16.mxu0 %v1614_v25  ;;  %v1421_v63 = vsub.f32 %v3162_v51, %v1334_v6  ;;  %v3168_v51 = vld [vmem:[#allocation49_spill] sm:$0xff] }
 0x38d   : > { %v2023_v16 = vpop.eup %2022 }
 0x38e   : > { %v1501_v34 = vmul.f32 1.442695, %v1422_v55  ;;  %v2025_v7 = vpop.eup %2024  ;;  %v1499_v4 = vmul.f32 1.442695, %v1421_v63 }
 0x38f   : > { %v1325_v35 = vpop.xlane.xlu1 %1324  ;;  %v2027_v48 = vpop.eup %2026  ;;  %v1613_v39 = vpack.c.bf16 %v2021_v9, %v2025_v7 }
 0x390   : > { %2038 = vpow2.f32 %v1501_v34  ;;  %v1612_v38 = vpack.c.bf16 %v2023_v16, %v2027_v48  ;;  %v1416_v11 = vsub.f32 %v3164_v0, %v1325_v35  ;;  %v2029_v45 = vpop.eup %2028  ;;  %v1415_v6 = vsub.f32 %v3167_v61, %v1325_v35 }
 0x391   : > { %2040 = vpow2.f32 %v1503_v2 }
 0x392   : > { %1636 = vmatpush1.bf16.xpose.msra.mxu0 %v1613_v39  ;;  %2042 = vpow2.f32 %v1497_v56  ;;  %v1489_v60 = vmul.f32 1.442695, %v1416_v11  ;;  %v1487_v55 = vmul.f32 1.442695, %v1415_v6  ;;  %v3169_v39 = vld [vmem:[#allocation50_spill] sm:$0xff] }
 0x393   : > { %1637 = vmatprep.subr.bf16.mxu0 %v1612_v38  ;;  %v1328_v26 = vpop.xlane.xlu1 %1327  ;;  %2044 = vpow2.f32 %v1499_v4 }
 0x394   : > { %v1418_v36 = vsub.f32 %v3165_v54, %v1328_v26  ;;  %v1417_v15 = vsub.f32 %v3166_v17, %v1328_v26 }
 0x395   : > { %v2031_v49 = vpop.eup %2030 }
 0x396   : > { %v1493_v5 = vmul.f32 1.442695, %v1418_v36  ;;  %v2033_v62 = vpop.eup %2032  ;;  %v1491_v25 = vmul.f32 1.442695, %v1417_v15 }
 0x397   : > { %v2035_v22 = vpop.eup %2034  ;;  %v1322_v10 = vpop.xlane.xlu1 %1321  ;;  %v1611_v58 = vpack.c.bf16 %v2029_v45, %v2033_v62  ;;  %v3171_v45 = vld [vmem:[#allocation44_spill] sm:$0xff]  ;;  %v3172_v62 = vld [vmem:[#allocation47_spill] sm:$0xff] }
 0x398   : > { %2046 = vpow2.f32 %v1493_v5  ;;  %v1610_v52 = vpack.c.bf16 %v2031_v49, %v2035_v22  ;;  %v2037_v53 = vpop.eup %2036  ;;  %v1413_v35 = vsub.f32 %v3168_v51, %v1322_v10  ;;  %v1414_v38 = vsub.f32 %v3169_v39, %v1322_v10  ;;  %v3173_v22 = vld [vmem:[#allocation48_spill] sm:$0xff] }
 0x399   : > { %2048 = vpow2.f32 %v1495_v50 }
 0x39a   : > { %1638 = vmatpush1.bf16.xpose.msra.mxu0 %v1611_v58  ;;  %2050 = vpow2.f32 %v1489_v60  ;;  %v1483_v4 = vmul.f32 1.442695, %v1413_v35  ;;  %v1485_v36 = vmul.f32 1.442695, %v1414_v38 }
 0x39b   : > { %1639 = vmatprep.subr.bf16.mxu0 %v1610_v52  ;;  %v1313_v9 = vpop.xlane.xlu1 %1312  ;;  %2052 = vpow2.f32 %v1491_v25  ;;  %v3174_v25 = vld [vmem:[#allocation45_spill] sm:$0xff] }
 0x39c   : > { %2054 = vpow2.f32 %v1487_v55  ;;  %v1408_v49 = vsub.f32 %v3171_v45, %v1313_v9 }
 0x39d   : > { %v2039_v8 = vpop.eup %2038  ;;  %2056 = vpow2.f32 %v1483_v4 }
 0x39e   : > { %v2041_v16 = vpop.eup %2040  ;;  %2058 = vpow2.f32 %v1485_v36  ;;  %v1473_v6 = vmul.f32 1.442695, %v1408_v49 }
 0x39f   : > { %v2043_v2 = vpop.eup %2042  ;;  %v1609_v34 = vpack.c.bf16 %v2037_v53, %v2041_v16  ;;  %v1316_v56 = vpop.xlane.xlu1 %1315  ;;  %v3175_v16 = vld [vmem:[#allocation43_spill] sm:$0xff] }
 0x3a0   : > { %v1608_v7 = vpack.c.bf16 %v2039_v8, %v2043_v2  ;;  %v2045_v48 = vpop.eup %2044  ;;  %v1410_v0 = vsub.f32 %v3170_v32, %v1316_v56  ;;  %v1409_v53 = vsub.f32 %v3174_v25, %v1316_v56  ;;  %v1407_v2 = vsub.f32 %v3175_v16, %v1313_v9  ;;  %v3178_v32 = vld [vmem:[#allocation11_spill] sm:$0xff] }
 0x3a2   : > { %1640 = vmatpush1.bf16.xpose.msra.mxu0 %v1609_v34  ;;  %v1477_v50 = vmul.f32 1.442695, %v1410_v0  ;;  %v3176_v34 = vld [vmem:[#allocation42_spill] sm:$0xff]  ;;  %v1475_v35 = vmul.f32 1.442695, %v1409_v53  ;;  %v3180_v53 = vld [vmem:[#allocation13_spill] sm:$0xff] }
 0x3a3   : > { %1641 = vmatprep.subr.bf16.mxu0 %v1608_v7  ;;  %v1471_v38 = vmul.f32 1.442695, %v1407_v2 }
 0x3a4   : > { %2060 = vpow2.f32 %v1477_v50 }
 0x3a5   : > { %v2047_v63 = vpop.eup %2046 }
 0x3a6   : > { %v2049_v42 = vpop.eup %2048 }
 0x3a7   : > { %v2051_v11 = vpop.eup %2050  ;;  %v1607_v26 = vpack.c.bf16 %v2045_v48, %v2049_v42  ;;  %v3177_v48 = vld [vmem:[#allocation9_spill] sm:$0xff] }
 0x3a8   : > { %v1606_v54 = vpack.c.bf16 %v2047_v63, %v2051_v11  ;;  %v2053_v15 = vpop.eup %2052 }
 0x3a9   : > { %v2055_v61 = vpop.eup %2054 }
 0x3aa   : > { %1642 = vmatpush1.bf16.xpose.msra.mxu0 %v1607_v26  ;;  %v1605_v8 = vpack.c.bf16 %v2053_v15, %v2055_v61  ;;  %v2057_v11 = vpop.eup %2056  ;;  %v3179_v26 = vld [vmem:[#allocation12_spill] sm:$0xff] }
 0x3ab   : > { %1643 = vmatprep.subr.bf16.mxu0 %v1606_v54  ;;  %v1319_v5 = vpop.xlane.xlu0 %1318  ;;  %v2059_v54 = vpop.eup %2058 }
 0x3ac   : > { %v1411_v60 = vsub.f32 %v3172_v62, %v1319_v5  ;;  %v1412_v17 = vsub.f32 %v3173_v22, %v1319_v5 }
 0x3ae   : > { %v1403_v10 = vpop.xlane.xlu1 %1402  ;;  %v1479_v58 = vmul.f32 1.442695, %v1411_v60  ;;  %v1481_v52 = vmul.f32 1.442695, %v1412_v17 }
 0x3af   : > { %v1468_v51 = vsub.f32 %v3177_v48, %v1403_v10  ;;  %v1467_v9 = vsub.f32 %v3179_v26, %v1403_v10  ;;  %v1394_v61 = vpop.xlane.xlu0 %1393 }
 0x3b0   : > { %2062 = vpow2.f32 %v1479_v58 }
 0x3b1   : > { %2064 = vpow2.f32 %v1481_v52  ;;  %v1593_v42 = vmul.f32 1.442695, %v1468_v51  ;;  %v2061_v45 = vpop.eup %2060  ;;  %v1591_v22 = vmul.f32 1.442695, %v1467_v9 }
 0x3b2   : > { %v1406_v55 = vpop.xlane.xlu1 %1405  ;;  %1644 = vmatpush1.bf16.xpose.msra.mxu0 %v1605_v8  ;;  %2066 = vpow2.f32 %v1473_v6  ;;  %v1462_v8 = vsub.f32 %v3180_v53, %v1394_v61 }
 0x3b3   : > { %v1470_v7 = vsub.f32 %v3176_v34, %v1406_v55  ;;  %2068 = vpow2.f32 %v1475_v35  ;;  %v1469_v56 = vsub.f32 %v3178_v32, %v1406_v55  ;;  %v1388_v35 = vpop.xlane.xlu0 %1387  ;;  %v3181_v32 = vld [vmem:[#allocation10_spill] sm:$0xff] }
 0x3b5   : > { %v1597_v63 = vmul.f32 1.442695, %v1470_v7  ;;  %v1595_v49 = vmul.f32 1.442695, %v1469_v56  ;;  %v1461_v56 = vsub.f32 %v3181_v32, %v1394_v61 }
 0x3b6   : > { %v1397_v39 = vpop.xlane.xlu1 %1396 }
 0x3b7   : > { %2070 = vpow2.f32 %v1597_v63  ;;  %v1464_v36 = vsub.f32 %v2787_v59, %v1397_v39  ;;  %v1463_v25 = vsub.f32 %v2784_v24, %v1397_v39 }
 0x3b8   : > { %2072 = vpow2.f32 %v1471_v38 }
 0x3b9   : > { %2074 = vpow2.f32 %v1593_v42  ;;  %v1585_v17 = vmul.f32 1.442695, %v1464_v36  ;;  %v1583_v7 = vmul.f32 1.442695, %v1463_v25 }
 0x3ba   : > { %v1400_v0 = vpop.xlane.xlu1 %1399  ;;  %2076 = vpow2.f32 %v1595_v49 }
 0x3bb   : > { %v1466_v4 = vsub.f32 %v2794_v30, %v1400_v0  ;;  %v1465_v10 = vsub.f32 %v2792_v41, %v1400_v0  ;;  %v1458_v0 = vsub.f32 %v2764_v23, %v1388_v35 }
 0x3bd   : > { %v2063_v50 = vpop.eup %2062  ;;  %v1589_v5 = vmul.f32 1.442695, %v1466_v4  ;;  %v1587_v55 = vmul.f32 1.442695, %v1465_v10 }
 0x3be   : > { %v1391_v62 = vpop.xlane.xlu1 %1390  ;;  %v2065_v60 = vpop.eup %2064  ;;  %v1603_v58 = vpack.c.bf16 %v2057_v11, %v2063_v50 }
 0x3bf   : > { %v1604_v15 = vpack.c.bf16 %v2059_v54, %v2065_v60  ;;  %v2067_v52 = vpop.eup %2066  ;;  %2078 = vpow2.f32 %v1589_v5  ;;  %v1460_v30 = vsub.f32 %v2771_v37, %v1391_v62  ;;  %v1581_v37 = vmul.f32 1.442695, %v1462_v8  ;;  %v1382_v50 = vpop.xlane.xlu0 %1381 }
 0x3c0   : > { %v1602_v59 = vpack.c.bf16 %v2061_v45, %v2067_v52  ;;  %2080 = vpow2.f32 %v1591_v22  ;;  %v2069_v16 = vpop.eup %2068  ;;  %v1459_v63 = vsub.f32 %v2767_v18, %v1391_v62  ;;  %v1579_v54 = vmul.f32 1.442695, %v1461_v56  ;;  %v2917_v45 = vpop.f32.mrf.mxu0 }
 0x3c1   : > { %1645 = vmatprep.subr.bf16.mxu0 %v1604_v15  ;;  %2082 = vpow2.f32 %v1585_v17  ;;  %v1577_v2 = vmul.f32 1.442695, %v1460_v30  ;;  %v1457_v17 = vsub.f32 %v2760_v57, %v1388_v35  ;;  %v1454_v15 = vsub.f32 %v2750_v13, %v1382_v50 }
 0x3c2   : > { %v1385_v6 = vpop.xlane.xlu1 %1384  ;;  %1646 = vmatpush1.bf16.xpose.msra.mxu0 %v1603_v58  ;;  %2084 = vpow2.f32 %v1587_v55  ;;  %v1575_v11 = vmul.f32 1.442695, %v1459_v63  ;;  %v366_v58 = vpop.f32.mrf.mxu0 }
 0x3c3   : > { %1647 = vmatprep.subr.bf16.mxu0 %v1602_v59  ;;  %2086 = vpow2.f32 %v1577_v2  ;;  %v1456_v39 = vsub.f32 %v2757_v33, %v1385_v6  ;;  %v1573_v33 = vmul.f32 1.442695, %v1458_v0  ;;  %v1455_v5 = vsub.f32 %v2752_v27, %v1385_v6  ;;  %v1376_v8 = vpop.xlane.xlu0 %1375 }
 0x3c4   : > { %v2071_v41 = vpop.eup %2070  ;;  %2088 = vpow2.f32 %v1583_v7  ;;  %v1571_v59 = vmul.f32 1.442695, %v1457_v17  ;;  %v1565_v25 = vmul.f32 1.442695, %v1454_v15  ;;  %v1450_v7 = vsub.f32 %v2731_v20, %v1376_v8 }
 0x3c5   : > { %v2073_v48 = vpop.eup %2072  ;;  %2090 = vpow2.f32 %v1581_v37  ;;  %v1569_v9 = vmul.f32 1.442695, %v1456_v39  ;;  %v1567_v52 = vmul.f32 1.442695, %v1455_v5  ;;  %v1449_v32 = vsub.f32 %v2727_v14, %v1376_v8 }
 0x3c6   : > { %v2907_v34 = vpop.xlane.xlu1 %1378  ;;  %v2075_v51 = vpop.eup %2074  ;;  %v1601_v24 = vpack.c.bf16 %v2069_v16, %v2073_v48  ;;  %2092 = vpow2.f32 %v1575_v11  ;;  %v1557_v63 = vmul.f32 1.442695, %v1450_v7 }
 0x3c7   : > { %v1632_v38 = vpack.c.bf16 %v2071_v41, %v2075_v51  ;;  %v2077_v26 = vpop.eup %2076  ;;  %2094 = vpow2.f32 %v1569_v9  ;;  %v1452_v23 = vsub.f32 %v2742_v12, %v2907_v34  ;;  %v1451_v57 = vsub.f32 %v2733_v21, %v2907_v34  ;;  %v1370_v39 = vpop.xlane.xlu0 %1369 }
 0x3c8   : > { %2096 = vpow2.f32 %v1579_v54  ;;  %v1453_v41 = vsub.f32 %v2746_v29, %v1382_v50  ;;  %v1446_v56 = vsub.f32 %v2715_v3, %v1370_v39 }
 0x3c9   : > { %2098 = vpow2.f32 %v1573_v33  ;;  %v1561_v27 = vmul.f32 1.442695, %v1452_v23  ;;  %v1559_v48 = vmul.f32 1.442695, %v1451_v57 }
 0x3ca   : > { %v2911_v42 = vpop.xlane.xlu1 %1372  ;;  %1648 = vmatpush1.bf16.xpose.msra.mxu0 %v1601_v24  ;;  %2100 = vpow2.f32 %v1567_v52  ;;  %v1563_v34 = vmul.f32 1.442695, %v1453_v41 }
 0x3cb   : > { %1649 = vmatprep.subr.bf16.mxu0 %v1632_v38  ;;  %2102 = vpow2.f32 %v1561_v27  ;;  %v1448_v16 = vsub.f32 %v2723_v46, %v2911_v42  ;;  %v1447_v46 = vsub.f32 %v2717_v47, %v2911_v42  ;;  %v1549_v42 = vmul.f32 1.442695, %v1446_v56 }
 0x3cc   : > { %v2079_v18 = vpop.eup %2078  ;;  %2104 = vpow2.f32 %v1571_v59 }
 0x3cd   : > { %v2081_v36 = vpop.eup %2080  ;;  %2106 = vpow2.f32 %v1565_v25  ;;  %v1553_v51 = vmul.f32 1.442695, %v1448_v16  ;;  %v1551_v0 = vmul.f32 1.442695, %v1447_v46 }
 0x3ce   : > { %v2915_v4 = vpop.xlane.xlu1 %1366  ;;  %v2083_v49 = vpop.eup %2082  ;;  %v1631_v62 = vpack.c.bf16 %v2077_v26, %v2081_v36  ;;  %2108 = vpow2.f32 %v1559_v48 }
 0x3cf   : > { %v1630_v60 = vpack.c.bf16 %v2079_v18, %v2083_v49  ;;  %v2085_v61 = vpop.eup %2084  ;;  %2110 = vpow2.f32 %v1553_v51  ;;  %v1444_v38 = vsub.f32 %v2707_v1, %v2915_v4  ;;  %v1555_v18 = vmul.f32 1.442695, %v1449_v32  ;;  %v1364_v36 = vpop.xlane.xlu0 %1363 }
 0x3d0   : > { %v2087_v30 = vpop.eup %2086  ;;  %2112 = vpow2.f32 %v1563_v34  ;;  %v1443_v1 = vsub.f32 %v2701_v31, %v2915_v4  ;;  %v1445_v49 = vsub.f32 %v2711_v19, %v1370_v39  ;;  %v1442_v50 = vsub.f32 %v2699_v43, %v1364_v36 }
 0x3d1   : > { %v2089_v6 = vpop.eup %2088  ;;  %2114 = vpow2.f32 %v1557_v63  ;;  %v1545_v26 = vmul.f32 1.442695, %v1444_v38  ;;  %v1441_v52 = vsub.f32 %v2695_v40, %v1364_v36 }
 0x3d2   : > { %v2922_v22 = vpop.xlane.xlu1 %1360  ;;  %1650 = vmatpush2.bf16.xpose.msra.mxu0 %v1631_v62  ;;  %v2091_v53 = vpop.eup %2090  ;;  %v1629_v55 = vpack.c.bf16 %v2085_v61, %v2089_v6  ;;  %2116 = vpow2.f32 %v1551_v0  ;;  %v1543_v5 = vmul.f32 1.442695, %v1443_v1  ;;  %v1547_v17 = vmul.f32 1.442695, %v1445_v49 }
 0x3d3   : > { %1651 = vmatprep.subr.bf16.mxu0 %v1630_v60  ;;  %v1628_v2 = vpack.c.bf16 %v2091_v53, %v2087_v30  ;;  %v2093_v37 = vpop.eup %2092  ;;  %2118 = vpow2.f32 %v1545_v26  ;;  %v1440_v14 = vsub.f32 %v2689_v44, %v2922_v22  ;;  %v1541_v4 = vmul.f32 1.442695, %v1442_v50  ;;  %v3182_v50 = vld [vmem:[#allocation6_spill] sm:$0xff] }
 0x3d4   : > { %v2095_v21 = vpop.eup %2094  ;;  %2120 = vpow2.f32 %v1555_v18  ;;  %v1439_v44 = vsub.f32 %v2683_v28, %v2922_v22  ;;  %v1539_v30 = vmul.f32 1.442695, %v1441_v52  ;;  %v1695_v18 = vstv %s198_s14 }
 0x3d5   : > { %v2097_v35 = vpop.eup %2096  ;;  %2122 = vpow2.f32 %v1549_v42  ;;  %v1537_v23 = vmul.f32 1.442695, %v1440_v14 }
 0x3d6   : > { %v2926_v10 = vpop.permute.xlu1 %239  ;;  %v2099_v24 = vpop.eup %2098  ;;  %v1627_v29 = vpack.c.bf16 %v2097_v35, %v2093_v37  ;;  %2124 = vpow2.f32 %v1543_v5  ;;  %v1535_v43 = vmul.f32 1.442695, %v1439_v44  ;;  %v1018_v35 = vlaneseq }
 0x3d7   : > { %v367_v12 = vadd.f32 %v366_v58, %v2926_v10  ;;  %v1626_v20 = vpack.c.bf16 %v2099_v24, %v2095_v21  ;;  %v2101_v11 = vpop.eup %2100  ;;  %2126 = vpow2.f32 %v1537_v23 }
 0x3d8   : > { %v2103_v9 = vpop.eup %2102  ;;  %2128 = vpow2.f32 %v1547_v17  ;;  %v1019_v39 = vshrl.u32 %v1018_v35, 7 }
 0x3d9   : > { %v1600_v13 = vpack.c.bf16 %v367_v12, %v367_v12  ;;  %v2105_v47 = vpop.eup %2104  ;;  %2130 = vpow2.f32 %v1541_v4 }
 0x3da   : > { %1652 = vmatpush2.bf16.xpose.msra.mxu0 %v1629_v55  ;;  %v2107_v54 = vpop.eup %2106  ;;  %v1625_v33 = vpack.c.bf16 %v2105_v47, %v2101_v11  ;;  %2132 = vpow2.f32 %v1535_v43  ;;  %v1020_v46 = vsub.s32 2, %v1019_v39 }
 0x3db   : > { %1665 = vmatprep.mubr.bf16.mxu0 %v1600_v13  ;;  %1653 = vmatprep.subr.bf16.mxu0 %v1628_v2  ;;  %v1624_v3 = vpack.c.bf16 %v2107_v54, %v2103_v9  ;;  %v2109_v62 = vpop.eup %2108  ;;  %2134 = vpow2.f32 %v1539_v30  ;;  %v365_v2 = vadd.f32 %v2917_v45, %v2926_v10 }
 0x3dc   : > { %v2111_v60 = vpop.eup %2110 }
 0x3dd   : > { %v2113_v31 = vpop.eup %2112  ;;  %v1599_v41 = vpack.c.bf16 %v365_v2, %v365_v2 }
 0x3de   : > { %v2115_v15 = vpop.eup %2114  ;;  %v1623_v58 = vpack.c.bf16 %v2113_v31, %v2109_v62 }
 0x3df   : > { %v1622_v19 = vpack.c.bf16 %v2115_v15, %v2111_v60  ;;  %v2117_v61 = vpop.eup %2116 }
 0x3e0   : > { %v2119_v27 = vpop.eup %2118 }
 0x3e1   : > { %v2121_v59 = vpop.eup %2120 }
 0x3e2   : > { %1654 = vmatpush2.bf16.xpose.msra.mxu0 %v1627_v29  ;;  %v2123_v12 = vpop.eup %2122  ;;  %v1621_v6 = vpack.c.bf16 %v2121_v59, %v2117_v61 }
 0x3e3   : > { %1655 = vmatprep.subr.bf16.mxu0 %v1626_v20  ;;  %v1620_v25 = vpack.c.bf16 %v2123_v12, %v2119_v27  ;;  %v2125_v28 = vpop.eup %2124 }
 0x3e4   : > { %v2127_v22 = vpop.eup %2126 }
 0x3e5   : > { %v2129_v53 = vpop.eup %2128 }
 0x3e6   : > { %v2131_v8 = vpop.eup %2130  ;;  %v1619_v40 = vpack.c.bf16 %v2129_v53, %v2125_v28 }
 0x3e7   : > { %v1618_v57 = vpack.c.bf16 %v2131_v8, %v2127_v22  ;;  %v2133_v13 = vpop.eup %2132 }
 0x3e8   : > { %v2135_v55 = vpop.eup %2134 }
 0x3e9   : > { %v1617_v16 = vpack.c.bf16 %v2135_v55, %v2133_v13 }
 0x3ea   : > { %1656 = vmatpush2.bf16.xpose.msra.mxu0 %v1625_v33 }
 0x3eb   : > { %1657 = vmatprep.subr.bf16.mxu0 %v1624_v3  ;;  %v2144_v3 = vld [vmem:[%s2299_s10] sm:$0xff]  ;;  %s2151_s10 = scalar_lea.vmem %s2150_s7, 256 }
 0x3ec   : > { %p2153_p1 = scmp.lt.s32.totalorder %s2151_s10, %s2145_s6 }
 0x3ee   : > { %p2154_p2 = por %p2153_p1, %p2152_p0 }
 0x3f0   : > { %p2155_p3 = pnand %p2154_p2, %p2148_p13 }
 0x3f2   : > { %1658 = vmatpush2.bf16.xpose.msra.mxu0 %v1623_v58 }
 0x3f3   : > { %1659 = vmatprep.subr.bf16.mxu0 %v1622_v19 }
 0x3fa   : > { %1660 = vmatpush2.bf16.xpose.msra.mxu0 %v1621_v6 }
 0x3fb   : > { %1661 = vmatprep.subr.bf16.mxu0 %v1620_v25 }
 0x402   : > { %1662 = vmatpush2.bf16.xpose.msra.mxu0 %v1619_v40 }
 0x403   : > { %1663 = vmatprep.subr.bf16.mxu0 %v1618_v57 }
 0x40a   : > { %1664 = vmatpush2.bf16.xpose.msra.mxu0 %v1617_v16 }
 0x411   : > { %1666 = vmatmul.mubr.bf16.vlgmr.msra.gmra.mxu0 %v1599_v41 }
 0x444   : > { %v1009_v7 = vpop.f32.mrf.mxu0 }
 0x445   : > { %2136 = vrcp.f32 %v1009_v7 }
 0x446   : > { %v1011_v48 = vpop.f32.mrf.mxu0 }
 0x447   : > { %2138 = vrcp.f32 %v1011_v48 }
 0x448   : > { %v1013_v37 = vpop.f32.mrf.mxu0 }
 0x44a   : > { %v1014_v51 = vpop.f32.mrf.mxu0 }
 0x452   : > { %v2137_v45 = vpop.eup %2136 }
 0x453   : > { %v1021_v38 = vrot.slane %v2137_v45, %v1020_v46 }
 0x454   : > { %v2139_v10 = vpop.eup %2138 }
 0x455   : > { %v1025_v56 = vrot.slane %v2139_v10, %v1020_v46  ;;  %v1026_v26 = vmul.f32 %v1021_v38, %v1009_v7 }
 0x457   : > { %v1027_v42 = vmul.f32 %v1025_v56, %v1011_v48 }
 0x4d1   : > { %v1667_v21 = vpop.f32.mrf.mxu0 }
 0x4d2   : > { %2140 = vrcp.f32 %v1667_v21 }
 0x4d3   : > { %v1669_v34 = vpop.f32.mrf.mxu0 }
 0x4d4   : > { %2142 = vrcp.f32 %v1669_v34 }
 0x4d5   : > { %v1671_v63 = vpop.f32.mrf.mxu0 }
 0x4d7   : > { %v1672_v24 = vpop.f32.mrf.mxu0 }
 0x4df   : > { %v2141_v29 = vpop.eup %2140 }
 0x4e0   : > { %v1679_v20 = vrot.slane %v2141_v29, %v1020_v46 }
 0x4e1   : > { %v2143_v32 = vpop.eup %2142 }
 0x4e2   : > { %v1684_v0 = vmul.f32 %v1679_v20, %v1667_v21  ;;  %v1683_v11 = vrot.slane %v2143_v32, %v1020_v46 }
 0x4e4   : > { %v1688_v9 = vrot.slane %v1684_v0, 6  ;;  %v1685_v47 = vmul.f32 %v1683_v11, %v1669_v34 }
 0x4e6   : > { %v1693_v54 = vsel %vm1692_vm3, %v1026_v26, %v1688_v9  ;;  %v1689_v36 = vrot.slane %v1685_v47, 6 }
 0x4e7   : > { %v1696_v1 = vmul.f32 %v1695_v18, %v1693_v54 }
 0x4e8   : > { %v1694_v33 = vsel %vm1692_vm3, %v1027_v42, %v1689_v36 }
 0x4e9   : > { %v1697_v14 = vmul.f32 %v1695_v18, %v1694_v33  ;;  %v1699_v49 = vadd.f32 %v2144_v3, %v1696_v1 }
 0x4eb   : > { %v1700_v5 = vadd.f32 %v1697_v14, %v3182_v50 }
 0x4ed   : > { %v1703_v62 = vcombine.low %v1699_v49, %v1700_v5 }
 0x4ef   : > { %1705 = vst [vmem:[%s191_s23] sm:$0xff] %v1703_v62 }
 0x4f0   : > { %2158 = shalt.err (!%p2155_p3)
}
 0x4f1   : > { %s2159_s8 = scalar_lea.hbm %s1719_s30, 128  ;;  %s2163_s12 = scalar_lea.hbm %s2992_s4, 256 }
 0x4f2   : > { %p2160_p4 = scmp.ne.s32.totalorder %s1719_s30, %s2159_s8  ;;  %p2164_p9 = scmp.lt.s32.totalorder %s1719_s30, %s2992_s4 }
 0x4f3   : > { %p2165_p10 = scmp.lt.s32.totalorder %s2163_s12, %s2159_s8 }
 0x4f4   : > { %p2161_p7 = pnand %p2160_p4, %p2276_p5 }
 0x4f5   : > { %p2166_p11 = por %p2165_p10, %p2164_p9 }
 0x4f6   : > { %p2162_p8 = pneg %p2161_p7 }
 0x4f8   : > { %p2167_p12 = pnand %p2166_p11, %p2162_p8 }
 0x4fa   : > { %2170 = shalt.err (!%p2167_p12)
}
 0x4fb   : > { %1836 = dma.vmem_to_hbm [thread:$0]  (%p2276_p5), %s1722_s24, 128, %s1719_s30, %s1707_s5  }
 0x4fc PF: > { %p1842_p13 = scmp.ge.s32.totalorder %s2205_s20, 2  ;;  %s1733_s15 = sand.u32 1, %s2193_s17  }
 0x4fd   : > { %s1734_s16 = scalar_lea.sflag [#allocation4], %s1733_s15 }
 0x4fe   : > { %p1839_p0 = pnand %p1842_p13, %p2280_p6 }
 0x500   : > { %p1840_p1 = pneg %p1839_p0 }
 0x502   : > { %2188 = dma.done.wait (%p1840_p1), %s1734_s16, 128  }
 0x503   : > { %2190 = vsyncadd (%p1840_p1), %s1734_s16, 4294967168  ;;  %p15_p2 = scmp.ge.s32.totalorder %s2263_s22, 4   ;;  %s3183_s17 = smov %s2197_s18 }
 0x504   : > { %s3184_s18 = smov %s2201_s19  ;;  %s3185_s19 = smov %s2274_s25 }
 0x505   : > { %s3186_s20 = smov %s2263_s22  ;;  %17 = sbr.rel (!%p15_p2) target bundleno = 5 (0x5), region = 71 }
 0x50a   :  { %1739 = vsyncpa [#allocation4], 1 }
 0x50b   :  { %1741 = vsyncpa [#allocation4 + $0x1], 1 }

</bundles_post_ra>
